<compile_context>
chip_gen: v5e
topology: v5e:2x2
jax: 0.10.0
libtpu: 0.0.40
codegen_flags: <defaults>
</compile_context>

<pallas_src>
import functools

import jax
import jax.numpy as jnp
from jax.experimental import pallas as pl
from jax.experimental.pallas import tpu as pltpu


def _round_up(a, b):
    return -(-a // b) * b


# ----------------------------------------------------------------------------
# Fused kernel: one grid step == TB samples, everything resident in VMEM
# ----------------------------------------------------------------------------
def _fused_forward_kernel(x_ref, wc_ref, cb_ref, fw_ref, fb_ref, o_ref, *, H, TB):
    """
    x_ref : [H, TB, Dk]       im2row'd input rows, Dk = 3*(W+2)*C
    wc_ref: [Dk, W*Cout]      folded conv weight (row + col tap shifts baked in)
    cb_ref: [1, W*Cout]       conv bias tiled across the W lane groups
    fw_ref: [H, W*Cout, K]    classifier weight permuted to feature layout
    fb_ref: [1, K]            classifier bias
    o_ref : [TB, K]           logits for this batch tile
    """
    Dk = x_ref.shape[-1]
    WCo = wc_ref.shape[-1]
    K = o_ref.shape[-1]

    # --- feature_extractor: conv(3x3, pad=1) + bias + ReLU -------------------
    # ONE MXU matmul per batch tile; rows are ordered (h, sample).
    lhs = x_ref[...].reshape(H * TB, Dk)                    # free: merge leading dims
    feat = jnp.dot(lhs, wc_ref[...],
                   preferred_element_type=jnp.float32)       # [H*TB, W*Cout]
    feat = jnp.maximum(feat + cb_ref[...], 0.0)              # bias + ReLU, lane-dense

    # --- connection_fn: flatten ----------------------------------------------
    # Implicit: the (h, w, cout) feature layout IS the flattened vector the
    # (trace-time permuted) classifier weight expects.
    feat = feat.reshape(H, TB, WCo)                          # free: split leading dim

    # --- classifier: Linear over all (h, w, cout) on the MXU -----------------
    # H small matmuls with only free leading-dim slices; accumulate [TB, K].
    acc = jnp.zeros((TB, K), jnp.float32)
    for h in range(H):
        acc += jnp.dot(feat[h], fw_ref[h],
                       preferred_element_type=jnp.float32)   # [TB, K]
    o_ref[...] = (acc + fb_ref[...]).astype(o_ref.dtype)


# ----------------------------------------------------------------------------
# Forward pass: trace-time layout plumbing + one fused pallas_call
# ----------------------------------------------------------------------------
def model_reconstructor_forward(x_nchw, params):
    """features = feature_extractor(x); features = connection_fn(features);
       return classifier(features)   -- exact PyTorch semantics, NCHW input."""
    N, C, H, W = x_nchw.shape
    conv_w, conv_b = params["conv_w"], params["conv_b"]
    fc_w, fc_b = params["fc_w"], params["fc_b"]
    Cout = conv_w.shape[0]
    K = fc_w.shape[0]
    assert conv_w.shape[2:] == (3, 3)
    assert fc_w.shape[1] == Cout * H * W
    WCo = W * Cout
    Dk = 3 * (W + 2) * C

    # ---- batch tiling: TB samples per grid step ------------------------------
    TB = _round_up(max(1, 256 // H), 8)          # TB*H ~ 256 rows (v6e/v7x MXU fill)
    if N < 2 * TB:                               # keep >= 2 grid steps (v7x: 2 TCs)
        TB = max(8, _round_up(-(-N // 2), 8))
    Np = max(2, -(-N // TB)) * TB                # pad batch; padded rows are discarded
    xb = jnp.pad(x_nchw, ((0, Np - N), (0, 0), (0, 0), (0, 0))) if Np != N else x_nchw

    # ---- trace-time constant / input layout plumbing -------------------------
    # Row-only im2row: x2[h, n, di*(W+2)*C + w2*C + c] = xpad[n, h+di, w2, c].
    # 3x input bytes (~15 KiB/sample here) buys a single 216-deep MXU matmul.
    xp = jnp.pad(jnp.transpose(xb, (0, 2, 3, 1)),
                 ((0, 0), (1, 1), (1, 1), (0, 0)))           # [Np, H+2, W+2, C]
    xrow = xp.reshape(Np, H + 2, (W + 2) * C)
    x2 = jnp.concatenate([xrow[:, di:di + H, :] for di in range(3)], axis=-1)
    x2 = jnp.transpose(x2, (1, 0, 2))                        # [H, Np, Dk] (h-major rows)

    # Folded conv weight: Wbig[(kh, w2, cin), (w, cout)] = conv_w[cout, cin, kh, w2-w]
    # for 0 <= w2-w <= 2, else 0.  Both tap shifts are baked in at trace time.
    wtap = jnp.transpose(conv_w, (2, 3, 1, 0)).astype(jnp.float32)   # [kh, kw, C, Cout]
    dj = jnp.arange(W + 2)[:, None] - jnp.arange(W)[None, :]          # [W+2, W]
    valid = ((dj >= 0) & (dj <= 2)).astype(jnp.float32)
    wsel = wtap[:, jnp.clip(dj, 0, 2)]                                # [3, W+2, W, C, Cout]
    wsel = wsel * valid[None, :, :, None, None]
    wc_big = jnp.transpose(wsel, (0, 1, 3, 2, 4)).reshape(Dk, WCo)    # [Dk, W*Cout]
    cb_big = jnp.tile(conv_b, W).reshape(1, WCo).astype(jnp.float32)

    # Classifier weight permuted to consume features in (h, w, cout) order,
    # preserving PyTorch's NCHW-flatten semantics exactly (constant, tiny).
    fw3 = jnp.transpose(fc_w.reshape(K, Cout, H, W), (2, 3, 1, 0)).reshape(H, WCo, K)
    fb = fc_b.reshape(1, K)

    kernel = functools.partial(_fused_forward_kernel, H=H, TB=TB)

    # True work (no zero-block inflation): conv + classifier MACs, x2 flops.
    flops = 2 * N * H * W * (9 * C * Cout + Cout * K)
    bytes_accessed = 4 * (x2.size + wc_big.size + cb_big.size
                          + fw3.size + fb.size + Np * K)

    # NOTE: per-step working set (input tile + folded weights + feature map) is
    # well under 1 MiB at these sizes; for much larger W the O(W^2) folded
    # weight is the first VMEM hazard -> tile the spatial axis as well.
    out = pl.pallas_call(
        kernel,
        out_shape=jax.ShapeDtypeStruct((Np, K), jnp.float32),
        grid=(Np // TB,),
        in_specs=[
            pl.BlockSpec((H, TB, Dk), lambda n: (0, n, 0)),
            pl.BlockSpec((Dk, WCo), lambda n: (0, 0)),
            pl.BlockSpec((1, WCo), lambda n: (0, 0)),
            pl.BlockSpec((H, WCo, K), lambda n: (0, 0, 0)),
            pl.BlockSpec((1, K), lambda n: (0, 0)),
        ],
        out_specs=pl.BlockSpec((TB, K), lambda n: (n, 0)),
        compiler_params=pltpu.CompilerParams(
            dimension_semantics=("parallel",)),
        cost_estimate=pl.CostEstimate(
            flops=flops, transcendentals=0, bytes_accessed=bytes_accessed),
    )(x2, wc_big, cb_big, fw3, fb)

    return out[:N]


# ----------------------------------------------------------------------------
# Pure-JAX reference (silent correctness assert) + parameter init
# ----------------------------------------------------------------------------
def _reference_forward(x_nchw, params):
    feat = jax.lax.conv_general_dilated(
        x_nchw, params["conv_w"], window_strides=(1, 1),
        padding=((1, 1), (1, 1)),
        dimension_numbers=("NCHW", "OIHW", "NCHW"))
    feat = jax.nn.relu(feat + params["conv_b"][None, :, None, None])
    feat = feat.reshape(x_nchw.shape[0], -1)
    return feat @ params["fc_w"].T + params["fc_b"][None, :]


def init_params(key, cin, cout, hw, num_classes):
    k1, k2, k3, k4 = jax.random.split(key, 4)
    conv_w = jax.random.normal(k1, (cout, cin, 3, 3), jnp.float32) * 0.1
    conv_b = jax.random.normal(k2, (cout,), jnp.float32) * 0.1
    fc_in = cout * hw * hw
    fc_w = jax.random.normal(k3, (num_classes, fc_in), jnp.float32) * 0.05
    fc_b = jax.random.normal(k4, (num_classes,), jnp.float32) * 0.05
    return {"conv_w": conv_w, "conv_b": conv_b, "fc_w": fc_w, "fc_b": fc_b}


if __name__ == "__main__":
    key = jax.random.PRNGKey(0)
    kx, kp = jax.random.split(key)

    N, C, H, W = 2, 4, 16, 16
    num_classes = 10

    x = jax.random.normal(kx, (N, C, H, W), jnp.float32)   # NCHW, like PyTorch
    params = init_params(kp, C, 8, H, num_classes)

    fwd = jax.jit(model_reconstructor_forward)
    out = jax.block_until_ready(fwd(x, params))
    assert out.shape == (N, num_classes), out.shape

    ref = jax.block_until_ready(_reference_forward(x, params))
    assert jnp.allclose(out, ref, atol=2e-4, rtol=1e-4)

    print("KERNEL_OK")
</pallas_src>

<mosaic_0001>
module attributes {stable_mosaic.version = 11 : i64} {
  func.func @_fused_forward_kernel(%arg0: i32, %arg1: memref<16x8x216xf32, #tpu.memory_space<vmem>>, %arg2: memref<216x128xf32, #tpu.memory_space<vmem>>, %arg3: memref<1x128xf32, #tpu.memory_space<vmem>>, %arg4: memref<16x128x10xf32, #tpu.memory_space<vmem>>, %arg5: memref<1x10xf32, #tpu.memory_space<vmem>>, %arg6: memref<8x10xf32, #tpu.memory_space<vmem>>) attributes {dimension_semantics = [#tpu.dimension_semantics<parallel>], iteration_bounds = array<i64: 2>, scalar_prefetch = 0 : i64, scratch_operands = 0 : i64, tpu.core_type = #tpu.core_type<tc>, window_params = [{transform_indices = @transform_0, window_bounds = array<i64: 16, 8, 216>}, {pipeline_mode = #tpu.pipeline_mode<synchronous>, transform_indices = @transform_1, window_bounds = array<i64: 216, 128>}, {pipeline_mode = #tpu.pipeline_mode<synchronous>, transform_indices = @transform_2, window_bounds = array<i64: 1, 128>}, {pipeline_mode = #tpu.pipeline_mode<synchronous>, transform_indices = @transform_3, window_bounds = array<i64: 16, 128, 10>}, {pipeline_mode = #tpu.pipeline_mode<synchronous>, transform_indices = @transform_4, window_bounds = array<i64: 1, 10>}, {transform_indices = @transform_5, window_bounds = array<i64: 8, 10>}]} {
    %c0 = arith.constant 0 : index
    %c0_0 = arith.constant 0 : index
    %c0_1 = arith.constant 0 : index
    %0 = vector.load %arg1[%c0, %c0_0, %c0_1] : memref<16x8x216xf32, #tpu.memory_space<vmem>>, vector<16x8x216xf32>
    %1 = vector.shape_cast %0 : vector<16x8x216xf32> to vector<128x216xf32>
    %c0_2 = arith.constant 0 : index
    %c0_3 = arith.constant 0 : index
    %2 = vector.load %arg2[%c0_2, %c0_3] : memref<216x128xf32, #tpu.memory_space<vmem>>, vector<216x128xf32>
    %cst = arith.constant dense<0.000000e+00> : vector<128x128xf32>
    %3 = tpu.matmul %1, %2, %cst {dimension_numbers = #tpu.dot_dimension_numbers<[1], [0], [0], [1], [0, 0, 1, 1], [], []>} : vector<128x216xf32>, vector<216x128xf32>, vector<128x128xf32> -> vector<128x128xf32>
    %c0_4 = arith.constant 0 : index
    %c0_5 = arith.constant 0 : index
    %4 = vector.load %arg3[%c0_4, %c0_5] : memref<1x128xf32, #tpu.memory_space<vmem>>, vector<1x128xf32>
    %5 = vector.broadcast %4 : vector<1x128xf32> to vector<128x128xf32>
    %6 = arith.addf %3, %5 : vector<128x128xf32>
    %cst_6 = arith.constant 0.000000e+00 : f32
    %7 = vector.broadcast %cst_6 : f32 to vector<128x128xf32>
    %8 = arith.maximumf %6, %7 : vector<128x128xf32>
    %9 = vector.shape_cast %8 : vector<128x128xf32> to vector<16x8x128xf32>
    %cst_7 = arith.constant 0.000000e+00 : f32
    %10 = vector.broadcast %cst_7 : f32 to vector<8x10xf32>
    %11 = vector.extract_strided_slice %9 {offsets = [0, 0, 0], sizes = [1, 8, 128], strides = [1, 1, 1]} : vector<16x8x128xf32> to vector<1x8x128xf32>
    %12 = vector.shape_cast %11 : vector<1x8x128xf32> to vector<8x128xf32>
    %c0_8 = arith.constant 0 : index
    %c0_9 = arith.constant 0 : index
    %c0_10 = arith.constant 0 : index
    %13 = vector.load %arg4[%c0_8, %c0_9, %c0_10] : memref<16x128x10xf32, #tpu.memory_space<vmem>>, vector<1x128x10xf32>
    %14 = vector.shape_cast %13 : vector<1x128x10xf32> to vector<128x10xf32>
    %cst_11 = arith.constant dense<0.000000e+00> : vector<8x10xf32>
    %15 = tpu.matmul %12, %14, %cst_11 {dimension_numbers = #tpu.dot_dimension_numbers<[1], [0], [0], [1], [0, 0, 1, 1], [], []>} : vector<8x128xf32>, vector<128x10xf32>, vector<8x10xf32> -> vector<8x10xf32>
    %16 = arith.addf %10, %15 : vector<8x10xf32>
    %17 = vector.extract_strided_slice %9 {offsets = [1, 0, 0], sizes = [1, 8, 128], strides = [1, 1, 1]} : vector<16x8x128xf32> to vector<1x8x128xf32>
    %18 = vector.shape_cast %17 : vector<1x8x128xf32> to vector<8x128xf32>
    %c1 = arith.constant 1 : index
    %c0_12 = arith.constant 0 : index
    %c0_13 = arith.constant 0 : index
    %19 = vector.load %arg4[%c1, %c0_12, %c0_13] : memref<16x128x10xf32, #tpu.memory_space<vmem>>, vector<1x128x10xf32>
    %20 = vector.shape_cast %19 : vector<1x128x10xf32> to vector<128x10xf32>
    %cst_14 = arith.constant dense<0.000000e+00> : vector<8x10xf32>
    %21 = tpu.matmul %18, %20, %cst_14 {dimension_numbers = #tpu.dot_dimension_numbers<[1], [0], [0], [1], [0, 0, 1, 1], [], []>} : vector<8x128xf32>, vector<128x10xf32>, vector<8x10xf32> -> vector<8x10xf32>
    %22 = arith.addf %16, %21 : vector<8x10xf32>
    %23 = vector.extract_strided_slice %9 {offsets = [2, 0, 0], sizes = [1, 8, 128], strides = [1, 1, 1]} : vector<16x8x128xf32> to vector<1x8x128xf32>
    %24 = vector.shape_cast %23 : vector<1x8x128xf32> to vector<8x128xf32>
    %c2 = arith.constant 2 : index
    %c0_15 = arith.constant 0 : index
    %c0_16 = arith.constant 0 : index
    %25 = vector.load %arg4[%c2, %c0_15, %c0_16] : memref<16x128x10xf32, #tpu.memory_space<vmem>>, vector<1x128x10xf32>
    %26 = vector.shape_cast %25 : vector<1x128x10xf32> to vector<128x10xf32>
    %cst_17 = arith.constant dense<0.000000e+00> : vector<8x10xf32>
    %27 = tpu.matmul %24, %26, %cst_17 {dimension_numbers = #tpu.dot_dimension_numbers<[1], [0], [0], [1], [0, 0, 1, 1], [], []>} : vector<8x128xf32>, vector<128x10xf32>, vector<8x10xf32> -> vector<8x10xf32>
    %28 = arith.addf %22, %27 : vector<8x10xf32>
    %29 = vector.extract_strided_slice %9 {offsets = [3, 0, 0], sizes = [1, 8, 128], strides = [1, 1, 1]} : vector<16x8x128xf32> to vector<1x8x128xf32>
    %30 = vector.shape_cast %29 : vector<1x8x128xf32> to vector<8x128xf32>
    %c3 = arith.constant 3 : index
    %c0_18 = arith.constant 0 : index
    %c0_19 = arith.constant 0 : index
    %31 = vector.load %arg4[%c3, %c0_18, %c0_19] : memref<16x128x10xf32, #tpu.memory_space<vmem>>, vector<1x128x10xf32>
    %32 = vector.shape_cast %31 : vector<1x128x10xf32> to vector<128x10xf32>
    %cst_20 = arith.constant dense<0.000000e+00> : vector<8x10xf32>
    %33 = tpu.matmul %30, %32, %cst_20 {dimension_numbers = #tpu.dot_dimension_numbers<[1], [0], [0], [1], [0, 0, 1, 1], [], []>} : vector<8x128xf32>, vector<128x10xf32>, vector<8x10xf32> -> vector<8x10xf32>
    %34 = arith.addf %28, %33 : vector<8x10xf32>
    %35 = vector.extract_strided_slice %9 {offsets = [4, 0, 0], sizes = [1, 8, 128], strides = [1, 1, 1]} : vector<16x8x128xf32> to vector<1x8x128xf32>
    %36 = vector.shape_cast %35 : vector<1x8x128xf32> to vector<8x128xf32>
    %c4 = arith.constant 4 : index
    %c0_21 = arith.constant 0 : index
    %c0_22 = arith.constant 0 : index
    %37 = vector.load %arg4[%c4, %c0_21, %c0_22] : memref<16x128x10xf32, #tpu.memory_space<vmem>>, vector<1x128x10xf32>
    %38 = vector.shape_cast %37 : vector<1x128x10xf32> to vector<128x10xf32>
    %cst_23 = arith.constant dense<0.000000e+00> : vector<8x10xf32>
    %39 = tpu.matmul %36, %38, %cst_23 {dimension_numbers = #tpu.dot_dimension_numbers<[1], [0], [0], [1], [0, 0, 1, 1], [], []>} : vector<8x128xf32>, vector<128x10xf32>, vector<8x10xf32> -> vector<8x10xf32>
    %40 = arith.addf %34, %39 : vector<8x10xf32>
    %41 = vector.extract_strided_slice %9 {offsets = [5, 0, 0], sizes = [1, 8, 128], strides = [1, 1, 1]} : vector<16x8x128xf32> to vector<1x8x128xf32>
    %42 = vector.shape_cast %41 : vector<1x8x128xf32> to vector<8x128xf32>
    %c5 = arith.constant 5 : index
    %c0_24 = arith.constant 0 : index
    %c0_25 = arith.constant 0 : index
    %43 = vector.load %arg4[%c5, %c0_24, %c0_25] : memref<16x128x10xf32, #tpu.memory_space<vmem>>, vector<1x128x10xf32>
    %44 = vector.shape_cast %43 : vector<1x128x10xf32> to vector<128x10xf32>
    %cst_26 = arith.constant dense<0.000000e+00> : vector<8x10xf32>
    %45 = tpu.matmul %42, %44, %cst_26 {dimension_numbers = #tpu.dot_dimension_numbers<[1], [0], [0], [1], [0, 0, 1, 1], [], []>} : vector<8x128xf32>, vector<128x10xf32>, vector<8x10xf32> -> vector<8x10xf32>
    %46 = arith.addf %40, %45 : vector<8x10xf32>
    %47 = vector.extract_strided_slice %9 {offsets = [6, 0, 0], sizes = [1, 8, 128], strides = [1, 1, 1]} : vector<16x8x128xf32> to vector<1x8x128xf32>
    %48 = vector.shape_cast %47 : vector<1x8x128xf32> to vector<8x128xf32>
    %c6 = arith.constant 6 : index
    %c0_27 = arith.constant 0 : index
    %c0_28 = arith.constant 0 : index
    %49 = vector.load %arg4[%c6, %c0_27, %c0_28] : memref<16x128x10xf32, #tpu.memory_space<vmem>>, vector<1x128x10xf32>
    %50 = vector.shape_cast %49 : vector<1x128x10xf32> to vector<128x10xf32>
    %cst_29 = arith.constant dense<0.000000e+00> : vector<8x10xf32>
    %51 = tpu.matmul %48, %50, %cst_29 {dimension_numbers = #tpu.dot_dimension_numbers<[1], [0], [0], [1], [0, 0, 1, 1], [], []>} : vector<8x128xf32>, vector<128x10xf32>, vector<8x10xf32> -> vector<8x10xf32>
    %52 = arith.addf %46, %51 : vector<8x10xf32>
    %53 = vector.extract_strided_slice %9 {offsets = [7, 0, 0], sizes = [1, 8, 128], strides = [1, 1, 1]} : vector<16x8x128xf32> to vector<1x8x128xf32>
    %54 = vector.shape_cast %53 : vector<1x8x128xf32> to vector<8x128xf32>
    %c7 = arith.constant 7 : index
    %c0_30 = arith.constant 0 : index
    %c0_31 = arith.constant 0 : index
    %55 = vector.load %arg4[%c7, %c0_30, %c0_31] : memref<16x128x10xf32, #tpu.memory_space<vmem>>, vector<1x128x10xf32>
    %56 = vector.shape_cast %55 : vector<1x128x10xf32> to vector<128x10xf32>
    %cst_32 = arith.constant dense<0.000000e+00> : vector<8x10xf32>
    %57 = tpu.matmul %54, %56, %cst_32 {dimension_numbers = #tpu.dot_dimension_numbers<[1], [0], [0], [1], [0, 0, 1, 1], [], []>} : vector<8x128xf32>, vector<128x10xf32>, vector<8x10xf32> -> vector<8x10xf32>
    %58 = arith.addf %52, %57 : vector<8x10xf32>
    %59 = vector.extract_strided_slice %9 {offsets = [8, 0, 0], sizes = [1, 8, 128], strides = [1, 1, 1]} : vector<16x8x128xf32> to vector<1x8x128xf32>
    %60 = vector.shape_cast %59 : vector<1x8x128xf32> to vector<8x128xf32>
    %c8 = arith.constant 8 : index
    %c0_33 = arith.constant 0 : index
    %c0_34 = arith.constant 0 : index
    %61 = vector.load %arg4[%c8, %c0_33, %c0_34] : memref<16x128x10xf32, #tpu.memory_space<vmem>>, vector<1x128x10xf32>
    %62 = vector.shape_cast %61 : vector<1x128x10xf32> to vector<128x10xf32>
    %cst_35 = arith.constant dense<0.000000e+00> : vector<8x10xf32>
    %63 = tpu.matmul %60, %62, %cst_35 {dimension_numbers = #tpu.dot_dimension_numbers<[1], [0], [0], [1], [0, 0, 1, 1], [], []>} : vector<8x128xf32>, vector<128x10xf32>, vector<8x10xf32> -> vector<8x10xf32>
    %64 = arith.addf %58, %63 : vector<8x10xf32>
    %65 = vector.extract_strided_slice %9 {offsets = [9, 0, 0], sizes = [1, 8, 128], strides = [1, 1, 1]} : vector<16x8x128xf32> to vector<1x8x128xf32>
    %66 = vector.shape_cast %65 : vector<1x8x128xf32> to vector<8x128xf32>
    %c9 = arith.constant 9 : index
    %c0_36 = arith.constant 0 : index
    %c0_37 = arith.constant 0 : index
    %67 = vector.load %arg4[%c9, %c0_36, %c0_37] : memref<16x128x10xf32, #tpu.memory_space<vmem>>, vector<1x128x10xf32>
    %68 = vector.shape_cast %67 : vector<1x128x10xf32> to vector<128x10xf32>
    %cst_38 = arith.constant dense<0.000000e+00> : vector<8x10xf32>
    %69 = tpu.matmul %66, %68, %cst_38 {dimension_numbers = #tpu.dot_dimension_numbers<[1], [0], [0], [1], [0, 0, 1, 1], [], []>} : vector<8x128xf32>, vector<128x10xf32>, vector<8x10xf32> -> vector<8x10xf32>
    %70 = arith.addf %64, %69 : vector<8x10xf32>
    %71 = vector.extract_strided_slice %9 {offsets = [10, 0, 0], sizes = [1, 8, 128], strides = [1, 1, 1]} : vector<16x8x128xf32> to vector<1x8x128xf32>
    %72 = vector.shape_cast %71 : vector<1x8x128xf32> to vector<8x128xf32>
    %c10 = arith.constant 10 : index
    %c0_39 = arith.constant 0 : index
    %c0_40 = arith.constant 0 : index
    %73 = vector.load %arg4[%c10, %c0_39, %c0_40] : memref<16x128x10xf32, #tpu.memory_space<vmem>>, vector<1x128x10xf32>
    %74 = vector.shape_cast %73 : vector<1x128x10xf32> to vector<128x10xf32>
    %cst_41 = arith.constant dense<0.000000e+00> : vector<8x10xf32>
    %75 = tpu.matmul %72, %74, %cst_41 {dimension_numbers = #tpu.dot_dimension_numbers<[1], [0], [0], [1], [0, 0, 1, 1], [], []>} : vector<8x128xf32>, vector<128x10xf32>, vector<8x10xf32> -> vector<8x10xf32>
    %76 = arith.addf %70, %75 : vector<8x10xf32>
    %77 = vector.extract_strided_slice %9 {offsets = [11, 0, 0], sizes = [1, 8, 128], strides = [1, 1, 1]} : vector<16x8x128xf32> to vector<1x8x128xf32>
    %78 = vector.shape_cast %77 : vector<1x8x128xf32> to vector<8x128xf32>
    %c11 = arith.constant 11 : index
    %c0_42 = arith.constant 0 : index
    %c0_43 = arith.constant 0 : index
    %79 = vector.load %arg4[%c11, %c0_42, %c0_43] : memref<16x128x10xf32, #tpu.memory_space<vmem>>, vector<1x128x10xf32>
    %80 = vector.shape_cast %79 : vector<1x128x10xf32> to vector<128x10xf32>
    %cst_44 = arith.constant dense<0.000000e+00> : vector<8x10xf32>
    %81 = tpu.matmul %78, %80, %cst_44 {dimension_numbers = #tpu.dot_dimension_numbers<[1], [0], [0], [1], [0, 0, 1, 1], [], []>} : vector<8x128xf32>, vector<128x10xf32>, vector<8x10xf32> -> vector<8x10xf32>
    %82 = arith.addf %76, %81 : vector<8x10xf32>
    %83 = vector.extract_strided_slice %9 {offsets = [12, 0, 0], sizes = [1, 8, 128], strides = [1, 1, 1]} : vector<16x8x128xf32> to vector<1x8x128xf32>
    %84 = vector.shape_cast %83 : vector<1x8x128xf32> to vector<8x128xf32>
    %c12 = arith.constant 12 : index
    %c0_45 = arith.constant 0 : index
    %c0_46 = arith.constant 0 : index
    %85 = vector.load %arg4[%c12, %c0_45, %c0_46] : memref<16x128x10xf32, #tpu.memory_space<vmem>>, vector<1x128x10xf32>
    %86 = vector.shape_cast %85 : vector<1x128x10xf32> to vector<128x10xf32>
    %cst_47 = arith.constant dense<0.000000e+00> : vector<8x10xf32>
    %87 = tpu.matmul %84, %86, %cst_47 {dimension_numbers = #tpu.dot_dimension_numbers<[1], [0], [0], [1], [0, 0, 1, 1], [], []>} : vector<8x128xf32>, vector<128x10xf32>, vector<8x10xf32> -> vector<8x10xf32>
    %88 = arith.addf %82, %87 : vector<8x10xf32>
    %89 = vector.extract_strided_slice %9 {offsets = [13, 0, 0], sizes = [1, 8, 128], strides = [1, 1, 1]} : vector<16x8x128xf32> to vector<1x8x128xf32>
    %90 = vector.shape_cast %89 : vector<1x8x128xf32> to vector<8x128xf32>
    %c13 = arith.constant 13 : index
    %c0_48 = arith.constant 0 : index
    %c0_49 = arith.constant 0 : index
    %91 = vector.load %arg4[%c13, %c0_48, %c0_49] : memref<16x128x10xf32, #tpu.memory_space<vmem>>, vector<1x128x10xf32>
    %92 = vector.shape_cast %91 : vector<1x128x10xf32> to vector<128x10xf32>
    %cst_50 = arith.constant dense<0.000000e+00> : vector<8x10xf32>
    %93 = tpu.matmul %90, %92, %cst_50 {dimension_numbers = #tpu.dot_dimension_numbers<[1], [0], [0], [1], [0, 0, 1, 1], [], []>} : vector<8x128xf32>, vector<128x10xf32>, vector<8x10xf32> -> vector<8x10xf32>
    %94 = arith.addf %88, %93 : vector<8x10xf32>
    %95 = vector.extract_strided_slice %9 {offsets = [14, 0, 0], sizes = [1, 8, 128], strides = [1, 1, 1]} : vector<16x8x128xf32> to vector<1x8x128xf32>
    %96 = vector.shape_cast %95 : vector<1x8x128xf32> to vector<8x128xf32>
    %c14 = arith.constant 14 : index
    %c0_51 = arith.constant 0 : index
    %c0_52 = arith.constant 0 : index
    %97 = vector.load %arg4[%c14, %c0_51, %c0_52] : memref<16x128x10xf32, #tpu.memory_space<vmem>>, vector<1x128x10xf32>
    %98 = vector.shape_cast %97 : vector<1x128x10xf32> to vector<128x10xf32>
    %cst_53 = arith.constant dense<0.000000e+00> : vector<8x10xf32>
    %99 = tpu.matmul %96, %98, %cst_53 {dimension_numbers = #tpu.dot_dimension_numbers<[1], [0], [0], [1], [0, 0, 1, 1], [], []>} : vector<8x128xf32>, vector<128x10xf32>, vector<8x10xf32> -> vector<8x10xf32>
    %100 = arith.addf %94, %99 : vector<8x10xf32>
    %101 = vector.extract_strided_slice %9 {offsets = [15, 0, 0], sizes = [1, 8, 128], strides = [1, 1, 1]} : vector<16x8x128xf32> to vector<1x8x128xf32>
    %102 = vector.shape_cast %101 : vector<1x8x128xf32> to vector<8x128xf32>
    %c15 = arith.constant 15 : index
    %c0_54 = arith.constant 0 : index
    %c0_55 = arith.constant 0 : index
    %103 = vector.load %arg4[%c15, %c0_54, %c0_55] : memref<16x128x10xf32, #tpu.memory_space<vmem>>, vector<1x128x10xf32>
    %104 = vector.shape_cast %103 : vector<1x128x10xf32> to vector<128x10xf32>
    %cst_56 = arith.constant dense<0.000000e+00> : vector<8x10xf32>
    %105 = tpu.matmul %102, %104, %cst_56 {dimension_numbers = #tpu.dot_dimension_numbers<[1], [0], [0], [1], [0, 0, 1, 1], [], []>} : vector<8x128xf32>, vector<128x10xf32>, vector<8x10xf32> -> vector<8x10xf32>
    %106 = arith.addf %100, %105 : vector<8x10xf32>
    %c0_57 = arith.constant 0 : index
    %c0_58 = arith.constant 0 : index
    %107 = vector.load %arg5[%c0_57, %c0_58] : memref<1x10xf32, #tpu.memory_space<vmem>>, vector<1x10xf32>
    %108 = vector.broadcast %107 : vector<1x10xf32> to vector<8x10xf32>
    %109 = arith.addf %106, %108 : vector<8x10xf32>
    %c0_59 = arith.constant 0 : index
    %c0_60 = arith.constant 0 : index
    %110 = vector.load %arg6[%c0_59, %c0_60] : memref<8x10xf32, #tpu.memory_space<vmem>>, vector<8x10xf32>
    tpu.vector_store %arg6[%c0_59, %c0_60], %109 {strides = array<i32>} : memref<8x10xf32, #tpu.memory_space<vmem>>, vector<8x10xf32>,
    return
  }
  func.func @transform_0(%arg0: i32) -> (i32, i32, i32) {
    %c0_i32 = arith.constant 0 : i32
    %c0_i32_0 = arith.constant 0 : i32
    %c0_i32_1 = arith.constant 0 : i32
    return %c0_i32, %arg0, %c0_i32_0 : i32, i32, i32
  }
  func.func @transform_1(%arg0: i32) -> (i32, i32) {
    %c0_i32 = arith.constant 0 : i32
    %c0_i32_0 = arith.constant 0 : i32
    %c0_i32_1 = arith.constant 0 : i32
    return %c0_i32, %c0_i32_0 : i32, i32
  }
  func.func @transform_2(%arg0: i32) -> (i32, i32) {
    %c0_i32 = arith.constant 0 : i32
    %c0_i32_0 = arith.constant 0 : i32
    %c0_i32_1 = arith.constant 0 : i32
    return %c0_i32, %c0_i32_0 : i32, i32
  }
  func.func @transform_3(%arg0: i32) -> (i32, i32, i32) {
    %c0_i32 = arith.constant 0 : i32
    %c0_i32_0 = arith.constant 0 : i32
    %c0_i32_1 = arith.constant 0 : i32
    %c0_i32_2 = arith.constant 0 : i32
    return %c0_i32, %c0_i32_0, %c0_i32_1 : i32, i32, i32
  }
  func.func @transform_4(%arg0: i32) -> (i32, i32) {
    %c0_i32 = arith.constant 0 : i32
    %c0_i32_0 = arith.constant 0 : i32
    %c0_i32_1 = arith.constant 0 : i32
    return %c0_i32, %c0_i32_0 : i32, i32
  }
  func.func @transform_5(%arg0: i32) -> (i32, i32) {
    %c0_i32 = arith.constant 0 : i32
    %c0_i32_0 = arith.constant 0 : i32
    return %arg0, %c0_i32 : i32, i32
  }
}

</mosaic_0001>

<bundles_post_ra>
// kernel: tile.8
= control target key start
LH: loop header
LB: loop body
LE: loop exit
PB: predicated region body
PF: predicated region fallthrough
CT: control target
= control target key end

     0   :  { %s28_s0 = inlined_call_operand.vmem [shape: f32[8], index: 0, kind: input, shape index: {}]   ;;  %s29_s1 = inlined_call_operand.vmem [shape: f32[16,8], index: 1, kind: output, shape index: {}]  }
   0x1   :  { %v4_v0 = vld [vmem:[%s28_s0] ss:$0 sm:$0xff] }
   0x2   :  { %5 = vst [vmem:[%s29_s1] sm:$0xff] %v4_v0 }
   0x3   :  { %8 = vst [vmem:[%s29_s1 + $0x8] sm:$0xff] %v4_v0 }

// kernel: tile.9
= control target key start
LH: loop header
LB: loop body
LE: loop exit
PB: predicated region body
PF: predicated region fallthrough
CT: control target
= control target key end

     0   :  { %s131_s10 = smov 120   ;;  %s132_s11 = smov 104   ;;  %vm3_vm0 = vcmask 64512   ;;  %vm9_vm1 = vcmask 1048512   ;;  %vm15_vm2 = vcmask 982912   ;;  %vm21_vm3 = vcmask 917312   ;;  %s207_s0 = inlined_call_operand.vmem [shape: f32[16,8], index: 0, kind: input, shape index: {}]   ;;  %s208_s1 = inlined_call_operand.vmem [shape: f32[1,128], index: 1, kind: output, shape index: {}]  }
   0x1   :  { %v101_v0 = vld [vmem:[%s207_s0 + $0xf] sm:$0x1]   ;;  %v103_v1 = vld [vmem:[%s207_s0 + $0xd] sm:$0x1]   ;;  %v105_v2 = vld [vmem:[%s207_s0 + $0xb] sm:$0x1]  }
   0x2   :  { %7 = vrot.lane.b32.xlu0 %v101_v0, %s131_s10  ;;  %19 = vrot.lane.b32.xlu1 %v103_v1, %s132_s11  ;;  %s133_s14 = smov 88   ;;  %v102_v3 = vld [vmem:[%s207_s0 + $0xe] sm:$0x1]   ;;  %v104_v4 = vld [vmem:[%s207_s0 + $0xc] sm:$0x1]   ;;  %s134_s19 = smov 112  }
   0x3   :  { %31 = vrot.lane.b32.xlu2 %v105_v2, %s133_s14  ;;  %s135_s20 = smov 96   ;;  %v106_v5 = vld [vmem:[%s207_s0 + $0xa] sm:$0x1]   ;;  %s136_s23 = smov 80   ;;  %v107_v6 = vld [vmem:[%s207_s0 + $0x9] sm:$0x1]  }
   0x4   :  { %v108_v7 = vld [vmem:[%s207_s0 + $0x8] sm:$0x1]   ;;  %s137_s28 = smov 72   ;;  %s138_s29 = smov 64   ;;  %v109_v8 = vld [vmem:[%s207_s0 + $0x7] sm:$0x1]  }
   0x5   :  { %s139_s3 = smov 56   ;;  %v110_v9 = vld [vmem:[%s207_s0 + $0x6] sm:$0x1]   ;;  %v111_v10 = vld [vmem:[%s207_s0 + $0x5] sm:$0x1]   ;;  %s140_s8 = smov 48  }
   0x6   :  { %s141_s9 = smov 40   ;;  %v112_v11 = vld [vmem:[%s207_s0 + $0x4] sm:$0x1]   ;;  %s142_s12 = smov 32   ;;  %v113_v12 = vld [vmem:[%s207_s0 + $0x3] sm:$0x1]  }
   0x7   :  { %v114_v13 = vld [vmem:[%s207_s0 + $0x2] sm:$0x1]   ;;  %s143_s17 = smov 24   ;;  %s144_s18 = smov 16   ;;  %v115_v14 = vld [vmem:[%s207_s0 + $0x1] sm:$0x1]  }
   0x8   :  { %s145_s21 = smov 8   ;;  %v2_v15 = vld [vmem:[%s207_s0] sm:$0x1]   ;;  %vm27_vm4 = vcmask 851712   ;;  %vm33_vm5 = vcmask 786112   ;;  %vm39_vm6 = vcmask 720512  }
   0x9   :  { %4 = vst.msk [vmem:[#allocation0] sm:$0x1] %vm3_vm0, %v2_v15   ;;  %vm45_vm7 = vcmask 654912   ;;  %vm51_vm8 = vcmask 589312   ;;  %vm57_vm9 = vcmask 523712   ;;  %vm63_vm10 = vcmask 458112  }
   0xa   :  { %13 = vrot.lane.b32.xlu0 %v102_v3, %s134_s19  ;;  %25 = vrot.lane.b32.xlu1 %v104_v4, %s135_s20  ;;  %vm69_vm11 = vcmask 392512   ;;  %vm75_vm12 = vcmask 326912   ;;  %vm81_vm13 = vcmask 261312   ;;  %vm87_vm14 = vcmask 195712  }
   0xb   :  { %37 = vrot.lane.b32.xlu2 %v106_v5, %s136_s23  ;;  %vm93_vm15 = vcmask 130112  }
  0x12   :  { %43 = vrot.lane.b32.xlu0 %v107_v6, %s137_s28  ;;  %49 = vrot.lane.b32.xlu1 %v108_v7, %s138_s29 }
  0x13   :  { %55 = vrot.lane.b32.xlu2 %v109_v8, %s139_s3 }
  0x1a   :  { %61 = vrot.lane.b32.xlu0 %v110_v9, %s140_s8  ;;  %67 = vrot.lane.b32.xlu1 %v111_v10, %s141_s9 }
  0x1b   :  { %73 = vrot.lane.b32.xlu2 %v112_v11, %s142_s12 }
  0x22   :  { %79 = vrot.lane.b32.xlu0 %v113_v12, %s143_s17  ;;  %85 = vrot.lane.b32.xlu1 %v114_v13, %s144_s18 }
  0x23   :  { %91 = vrot.lane.b32.xlu2 %v115_v14, %s145_s21 }
  0x5d   :  { %v32_v16 = vpop.permute.xlu2 %31  }
  0x65   :  { %v38_v17 = vpop.permute.xlu2 %37  }
  0x6d   :  { %v56_v18 = vpop.permute.xlu2 %55  }
  0x74   :  { %v8_v19 = vpop.permute.xlu0 %7   ;;  %v20_v20 = vpop.permute.xlu1 %19  }
  0x75   :  { %10 = vst.msk [vmem:[#allocation0] sm:$0x1] %vm9_vm1, %v8_v19   ;;  %v74_v21 = vpop.permute.xlu2 %73  }
  0x7c   :  { %v14_v22 = vpop.permute.xlu0 %13   ;;  %v26_v23 = vpop.permute.xlu1 %25  }
  0x7d   :  { %16 = vst.msk [vmem:[#allocation0] sm:$0x1] %vm15_vm2, %v14_v22   ;;  %v92_v24 = vpop.permute.xlu2 %91  }
  0x7e   :  { %22 = vst.msk [vmem:[#allocation0] sm:$0x1] %vm21_vm3, %v20_v20  }
  0x7f   :  { %28 = vst.msk [vmem:[#allocation0] sm:$0x1] %vm27_vm4, %v26_v23  }
  0x80   :  { %34 = vst.msk [vmem:[#allocation0] sm:$0x1] %vm33_vm5, %v32_v16  }
  0x81   :  { %40 = vst.msk [vmem:[#allocation0] sm:$0x1] %vm39_vm6, %v38_v17  }
  0x84   :  { %v44_v25 = vpop.permute.xlu0 %43   ;;  %v50_v26 = vpop.permute.xlu1 %49  }
  0x85   :  { %46 = vst.msk [vmem:[#allocation0] sm:$0x1] %vm45_vm7, %v44_v25  }
  0x86   :  { %52 = vst.msk [vmem:[#allocation0] sm:$0x1] %vm51_vm8, %v50_v26  }
  0x87   :  { %58 = vst.msk [vmem:[#allocation0] sm:$0x1] %vm57_vm9, %v56_v18  }
  0x8c   :  { %v62_v27 = vpop.permute.xlu0 %61   ;;  %v68_v28 = vpop.permute.xlu1 %67  }
  0x8d   :  { %64 = vst.msk [vmem:[#allocation0] sm:$0x1] %vm63_vm10, %v62_v27  }
  0x8e   :  { %70 = vst.msk [vmem:[#allocation0] sm:$0x1] %vm69_vm11, %v68_v28  }
  0x8f   :  { %76 = vst.msk [vmem:[#allocation0] sm:$0x1] %vm75_vm12, %v74_v21  }
  0x94   :  { %v80_v29 = vpop.permute.xlu0 %79   ;;  %v86_v30 = vpop.permute.xlu1 %85  }
  0x95   :  { %82 = vst.msk [vmem:[#allocation0] sm:$0x1] %vm81_vm13, %v80_v29  }
  0x96   :  { %88 = vst.msk [vmem:[#allocation0] sm:$0x1] %vm87_vm14, %v86_v30  }
  0x97   :  { %94 = vst.msk [vmem:[#allocation0] sm:$0x1] %vm93_vm15, %v92_v24  }
  0x9e   :  { %v97_v31 = vld [vmem:[#allocation0] sm:$0x1] }
  0x9f   :  { %100 = vst [vmem:[%s208_s1] sm:$0x1] %v97_v31 }

// kernel: model_reconstructor_forward.1
= control target key start
LH: loop header
LB: loop body
LE: loop exit
PB: predicated region body
PF: predicated region fallthrough
CT: control target
= control target key end

     0   :  { %s1583_s18 = smov 0   ;;  %s1585_s19 = smov 0   ;;  %s2643_s0 = inlined_call_operand.vmem [shape: f32[16,16,216], index: 0, kind: input, shape index: {}]   ;;  %s2644_s1 = inlined_call_operand.vmem [shape: f32[216,128], index: 1, kind: input, shape index: {}]   ;;  %s2645_s2 = inlined_call_operand.vmem [shape: f32[1,128], index: 2, kind: input, shape index: {}]   ;;  %s2646_s3 = inlined_call_operand.vmem [shape: f32[16,128,10], index: 3, kind: input, shape index: {}]   ;;  %s2647_s4 = inlined_call_operand.vmem [shape: f32[1,10], index: 4, kind: input, shape index: {}]   ;;  %s2648_s5 = inlined_call_operand.vmem [shape: f32[16,10], index: 5, kind: output, shape index: {}]  }
   0x1   :  { %s1587_s20 = smov 0  }
   0x2 LB: > { %s1234_s21 = sadd.s32 4294967295, %s1551_s20   ;;  %s1600_s22 = sadd.s32 1, %s1551_s20   ;;  %s1551_s20 = sphi %s1587_s20, %s2651_s20   ;;  %s1547_s19 = sphi %s1585_s19, %s2650_s19   ;;  %s1543_s18 = sphi %s1583_s18, %s2649_s18  }
   0x3   : > { %s19_s23 = ssub.s32 %s1551_s20, %s1600_s22  ;;  %s22_s24 = sadd.s32 1, %s1547_s19 }
   0x4   : > { %p20_p0 = scmp.eq.s32.totalorder %s19_s23, 0  ;;  %p29_p1 = scmp.ne.s32.totalorder %s1547_s19, %s1543_s18 }
   0x5   : > { %p30_p2 = scmp.eq.s32.totalorder %s1551_s20, 0  ;;  %p1237_p4 = scmp.ge.s32.totalorder %s1551_s20, 2 }
   0x6   : > { %s1609_s25 = scalar_select %p20_p0, %s1547_s19, %s22_s24  }
   0x7   : > { %p31_p3 = por %p30_p2, %p29_p1  ;;  %177 = sbr.rel (%p1237_p4) target bundleno = 48 (0x30), region = 32 }
   0xc   : > { %180 = sbr.rel (!%p31_p3) target bundleno = 48 (0x30), region = 36  ;;  %s182_s26 = sand.u32 (%p31_p3), 1, %s1547_s19  }
   0xd   : > { %s1502_s27 = sshll.u32 (%p31_p3), %s1551_s20, 4  ;;  %s1238_s28 = sshll.u32 (%p31_p3), %s182_s26, 8 }
   0xe   : > { %s1617_s6 = scalar_lea.vmem (%p31_p3), %s2643_s0, %s1502_s27  ;;  %s1622_s7 = scalar_lea.vmem (%p31_p3), [#allocation2], %s1238_s28 }
   0xf   : > { %v200_v0 = vld [vmem:[%s1617_s6] sm:$0xff] (%p31_p3)  ;;  %v202_v1 = vld [vmem:[%s1617_s6 + $0x8] sm:$0xff] (%p31_p3) }
  0x10   : > { %v204_v2 = vld [vmem:[%s1617_s6 + $0x20] sm:$0xff] (%p31_p3)  ;;  %201 = vst [vmem:[%s1622_s7] sm:$0xff] (%p31_p3), %v200_v0  ;;  %v206_v3 = vld [vmem:[%s1617_s6 + $0x28] sm:$0xff] (%p31_p3) }
  0x11   : > { %203 = vst [vmem:[%s1622_s7 + $0x8] sm:$0xff] %v202_v1  ;;  %v208_v4 = vld [vmem:[%s1617_s6 + $0x40] sm:$0xff]  ;;  %v210_v5 = vld [vmem:[%s1617_s6 + $0x48] sm:$0xff] }
  0x12   : > { %205 = vst [vmem:[%s1622_s7 + $0x10] sm:$0xff] %v204_v2  ;;  %v212_v6 = vld [vmem:[%s1617_s6 + $0x60] sm:$0xff]  ;;  %v214_v7 = vld [vmem:[%s1617_s6 + $0x68] sm:$0xff] }
  0x13   : > { %207 = vst [vmem:[%s1622_s7 + $0x18] sm:$0xff] %v206_v3  ;;  %v216_v8 = vld [vmem:[%s1617_s6 + $0x80] sm:$0xff]  ;;  %v218_v9 = vld [vmem:[%s1617_s6 + $0x88] sm:$0xff] }
  0x14   : > { %209 = vst [vmem:[%s1622_s7 + $0x20] sm:$0xff] %v208_v4  ;;  %v220_v10 = vld [vmem:[%s1617_s6 + $0xa0] sm:$0xff]  ;;  %v222_v11 = vld [vmem:[%s1617_s6 + $0xa8] sm:$0xff] }
  0x15   : > { %211 = vst [vmem:[%s1622_s7 + $0x28] sm:$0xff] %v210_v5  ;;  %v224_v12 = vld [vmem:[%s1617_s6 + $0xc0] sm:$0xff]  ;;  %v226_v13 = vld [vmem:[%s1617_s6 + $0xc8] sm:$0xff] }
  0x16   : > { %213 = vst [vmem:[%s1622_s7 + $0x30] sm:$0xff] %v212_v6  ;;  %v228_v14 = vld [vmem:[%s1617_s6 + $0xe0] sm:$0xff]  ;;  %v230_v15 = vld [vmem:[%s1617_s6 + $0xe8] sm:$0xff] }
  0x17   : > { %215 = vst [vmem:[%s1622_s7 + $0x38] sm:$0xff] %v214_v7  ;;  %v232_v16 = vld [vmem:[%s1617_s6 + $0x100] sm:$0xff]  ;;  %v234_v17 = vld [vmem:[%s1617_s6 + $0x108] sm:$0xff] }
  0x18   : > { %217 = vst [vmem:[%s1622_s7 + $0x40] sm:$0xff] %v216_v8  ;;  %v236_v18 = vld [vmem:[%s1617_s6 + $0x120] sm:$0xff]  ;;  %v238_v19 = vld [vmem:[%s1617_s6 + $0x128] sm:$0xff] }
  0x19   : > { %219 = vst [vmem:[%s1622_s7 + $0x48] sm:$0xff] %v218_v9  ;;  %v240_v20 = vld [vmem:[%s1617_s6 + $0x140] sm:$0xff]  ;;  %v242_v21 = vld [vmem:[%s1617_s6 + $0x148] sm:$0xff] }
  0x1a   : > { %221 = vst [vmem:[%s1622_s7 + $0x50] sm:$0xff] %v220_v10  ;;  %v244_v22 = vld [vmem:[%s1617_s6 + $0x160] sm:$0xff]  ;;  %v246_v23 = vld [vmem:[%s1617_s6 + $0x168] sm:$0xff] }
  0x1b   : > { %223 = vst [vmem:[%s1622_s7 + $0x58] sm:$0xff] %v222_v11  ;;  %v248_v24 = vld [vmem:[%s1617_s6 + $0x180] sm:$0xff]  ;;  %v250_v25 = vld [vmem:[%s1617_s6 + $0x188] sm:$0xff] }
  0x1c   : > { %225 = vst [vmem:[%s1622_s7 + $0x60] sm:$0xff] %v224_v12  ;;  %v252_v26 = vld [vmem:[%s1617_s6 + $0x1a0] sm:$0xff]  ;;  %v254_v27 = vld [vmem:[%s1617_s6 + $0x1a8] sm:$0xff] }
  0x1d   : > { %227 = vst [vmem:[%s1622_s7 + $0x68] sm:$0xff] %v226_v13  ;;  %v256_v28 = vld [vmem:[%s1617_s6 + $0x1c0] sm:$0xff]  ;;  %v258_v29 = vld [vmem:[%s1617_s6 + $0x1c8] sm:$0xff] }
  0x1e   : > { %229 = vst [vmem:[%s1622_s7 + $0x70] sm:$0xff] %v228_v14  ;;  %v260_v30 = vld [vmem:[%s1617_s6 + $0x1e0] sm:$0xff]  ;;  %v262_v31 = vld [vmem:[%s1617_s6 + $0x1e8] sm:$0xff] }
  0x1f   : > { %231 = vst [vmem:[%s1622_s7 + $0x78] sm:$0xff] %v230_v15 }
  0x20   : > { %233 = vst [vmem:[%s1622_s7 + $0x80] sm:$0xff] %v232_v16 }
  0x21   : > { %235 = vst [vmem:[%s1622_s7 + $0x88] sm:$0xff] %v234_v17 }
  0x22   : > { %237 = vst [vmem:[%s1622_s7 + $0x90] sm:$0xff] %v236_v18 }
  0x23   : > { %239 = vst [vmem:[%s1622_s7 + $0x98] sm:$0xff] %v238_v19 }
  0x24   : > { %241 = vst [vmem:[%s1622_s7 + $0xa0] sm:$0xff] %v240_v20 }
  0x25   : > { %243 = vst [vmem:[%s1622_s7 + $0xa8] sm:$0xff] %v242_v21 }
  0x26   : > { %245 = vst [vmem:[%s1622_s7 + $0xb0] sm:$0xff] %v244_v22 }
  0x27   : > { %247 = vst [vmem:[%s1622_s7 + $0xb8] sm:$0xff] %v246_v23 }
  0x28   : > { %249 = vst [vmem:[%s1622_s7 + $0xc0] sm:$0xff] %v248_v24 }
  0x29   : > { %251 = vst [vmem:[%s1622_s7 + $0xc8] sm:$0xff] %v250_v25 }
  0x2a   : > { %253 = vst [vmem:[%s1622_s7 + $0xd0] sm:$0xff] %v252_v26 }
  0x2b   : > { %255 = vst [vmem:[%s1622_s7 + $0xd8] sm:$0xff] %v254_v27 }
  0x2c   : > { %257 = vst [vmem:[%s1622_s7 + $0xe0] sm:$0xff] %v256_v28 }
  0x2d   : > { %259 = vst [vmem:[%s1622_s7 + $0xe8] sm:$0xff] %v258_v29 }
  0x2e   : > { %261 = vst [vmem:[%s1622_s7 + $0xf0] sm:$0xff] %v260_v30 }
  0x2f   : > { %263 = vst [vmem:[%s1622_s7 + $0xf8] sm:$0xff] %v262_v31 }
  0x30 PF: > { %p1241_p5 = scmp.ge.s32.totalorder %s1551_s20, 1  ;;  %p268_p6 = scmp.lt.s32.totalorder %s1551_s20, 3 }
  0x32   : > { %p269_p7 = pnand %p1241_p5, %p268_p6 }
  0x33   : > { %s275_s29 = sand.u32 (!%p269_p7), 1, %s1543_s18   ;;  %p301_p8 = scmp.lt.s32.totalorder (!%p269_p7), %s1234_s21, 1 }
  0x34   : > { %272 = sbr.rel (%p269_p7) target bundleno = 496 (0x1f0), region = 59  ;;  %s1242_s9 = sshll.u32 (!%p269_p7), %s275_s29, 8 }
  0x35   : > { %s1757_s17 = scalar_lea.vmem (!%p269_p7), [#allocation2], %s1242_s9 }
  0x39   : > { %v352_v32 = vld [vmem:[%s2644_s1 + $0x78] sm:$0xff]  ;;  %v351_v33 = vld [vmem:[%s2644_s1 + $0x70] sm:$0xff]  ;;  %v350_v34 = vld [vmem:[%s2644_s1 + $0x68] sm:$0xff]  ;;  %vm368_vm0 = vcmask 719872   ;;  %s2653_s21 = smov (!%p301_p8, %s1234_s21), 1  ;;  %vm1173_vm1 = vcmask 80896  }
  0x3a   : > { %417 = vmatpush.msra.mxu0 %v352_v32  ;;  %v363_v35 = vld [vmem:[%s2644_s1 + $0xd0] sm:$0xff]  ;;  %v362_v36 = vld [vmem:[%s2644_s1 + $0xc8] sm:$0xff]  ;;  %v349_v37 = vld [vmem:[%s2644_s1 + $0x60] sm:$0xff]  ;;  %s1243_s8 = sshll.u32 %s2653_s21, 3 }
  0x3b   : > { %487 = vmatpush.msra.mxu1 %v363_v35  ;;  %v361_v38 = vld [vmem:[%s2644_s1 + $0xc0] sm:$0xff]  ;;  %v348_v39 = vld [vmem:[%s2644_s1 + $0x58] sm:$0xff]  ;;  %v347_v41 = vld [vmem:[%s2644_s1 + $0x50] sm:$0xff]  ;;  %s304_s13 = scalar_lea.vmem %s2648_s5, %s1243_s8 }
  0x3c   : > { %418 = vmatpush.msra.mxu0 %v351_v33  ;;  %v360_v40 = vld [vmem:[%s2644_s1 + $0xb8] sm:$0xff]  ;;  %v359_v42 = vld [vmem:[%s2644_s1 + $0xb0] sm:$0xff]  ;;  %v346_v43 = vld [vmem:[%s2644_s1 + $0x48] sm:$0xff] }
  0x3d   : > { %488 = vmatpush.msra.mxu1 %v362_v36  ;;  %v358_v44 = vld [vmem:[%s2644_s1 + $0xa8] sm:$0xff]  ;;  %v345_v45 = vld [vmem:[%s2644_s1 + $0x40] sm:$0xff]  ;;  %v344_v47 = vld [vmem:[%s2644_s1 + $0x38] sm:$0xff] }
  0x3e   : > { %419 = vmatpush.msra.mxu0 %v350_v34  ;;  %v357_v46 = vld [vmem:[%s2644_s1 + $0xa0] sm:$0xff]  ;;  %v356_v48 = vld [vmem:[%s2644_s1 + $0x98] sm:$0xff]  ;;  %v343_v49 = vld [vmem:[%s2644_s1 + $0x30] sm:$0xff] }
  0x3f   : > { %489 = vmatpush.msra.mxu1 %v361_v38  ;;  %v355_v50 = vld [vmem:[%s2644_s1 + $0x90] sm:$0xff]  ;;  %v342_v51 = vld [vmem:[%s2644_s1 + $0x28] sm:$0xff]  ;;  %v341_v53 = vld [vmem:[%s2644_s1 + $0x20] sm:$0xff] }
  0x40   : > { %420 = vmatpush.msra.mxu0 %v349_v37  ;;  %v354_v52 = vld [vmem:[%s2644_s1 + $0x88] sm:$0xff]  ;;  %v353_v54 = vld [vmem:[%s2644_s1 + $0x80] sm:$0xff]  ;;  %v340_v56 = vld [vmem:[%s2644_s1 + $0x18] sm:$0xff] }
  0x41   : > { %490 = vmatpush.msra.mxu1 %v360_v40  ;;  %v306_v55 = vld [vmem:[%s1757_s17 + $0x8] sm:$0xff]  ;;  %v339_v57 = vld [vmem:[%s2644_s1 + $0x10] sm:$0xff]  ;;  %v337_v59 = vld [vmem:[%s2644_s1] sm:$0xff] }
  0x42   : > { %421 = vmatpush.msra.mxu0 %v348_v39  ;;  %v338_v58 = vld [vmem:[%s2644_s1 + $0x8] sm:$0xff]  ;;  %v305_v60 = vld [vmem:[%s1757_s17] sm:$0xff]  ;;  %v308_v61 = vld [vmem:[%s1757_s17 + $0x18] sm:$0xff] }
  0x43   : > { %491 = vmatpush.msra.mxu1 %v359_v42  ;;  %v307_v62 = vld [vmem:[%s1757_s17 + $0x10] sm:$0xff]  ;;  %v310_v63 = vld [vmem:[%s1757_s17 + $0x28] sm:$0xff]  ;;  %v309_v0 = vld [vmem:[%s1757_s17 + $0x20] sm:$0xff] }
  0x44   : > { %422 = vmatpush.msra.mxu0 %v347_v41  ;;  %v312_v1 = vld [vmem:[%s1757_s17 + $0x38] sm:$0xff]  ;;  %v311_v2 = vld [vmem:[%s1757_s17 + $0x30] sm:$0xff]  ;;  %v314_v3 = vld [vmem:[%s1757_s17 + $0x48] sm:$0xff] }
  0x45   : > { %492 = vmatpush.msra.mxu1 %v358_v44  ;;  %v313_v4 = vld [vmem:[%s1757_s17 + $0x40] sm:$0xff]  ;;  %v316_v5 = vld [vmem:[%s1757_s17 + $0x58] sm:$0xff]  ;;  %v1274_v8 = vld [vmem:[%s2646_s3 + $0xf0] sm:$0xff] }
  0x46   : > { %423 = vmatpush.msra.mxu0 %v346_v43  ;;  %v1275_v6 = vld [vmem:[%s2646_s3 + $0xf8] sm:$0xff]  ;;  %v577_v9 = vld [vmem:[%s2646_s3 + $0x70] sm:$0xff]  ;;  %v318_v11 = vld [vmem:[%s1757_s17 + $0x68] sm:$0xff] }
  0x47   : > { %493 = vmatpush.msra.mxu1 %v357_v46  ;;  %v578_v7 = vld [vmem:[%s2646_s3 + $0x78] sm:$0xff]  ;;  %596 = vmatpush.msra.mxu2 %v1275_v6  ;;  %v315_v10 = vld [vmem:[%s1757_s17 + $0x50] sm:$0xff]  ;;  %v1273_v12 = vld [vmem:[%s2646_s3 + $0xe8] sm:$0xff] }
  0x48   : > { %424 = vmatpush.msra.mxu0 %v345_v45  ;;  %616 = vmatpush.msra.mxu3 %v578_v7  ;;  %v576_v13 = vld [vmem:[%s2646_s3 + $0x68] sm:$0xff]  ;;  %v1272_v14 = vld [vmem:[%s2646_s3 + $0xe0] sm:$0xff]  ;;  %v1271_v16 = vld [vmem:[%s2646_s3 + $0xd8] sm:$0xff] }
  0x49   : > { %494 = vmatpush.msra.mxu1 %v356_v48  ;;  %597 = vmatpush.msra.mxu2 %v1274_v8  ;;  %v575_v15 = vld [vmem:[%s2646_s3 + $0x60] sm:$0xff]  ;;  %v574_v17 = vld [vmem:[%s2646_s3 + $0x58] sm:$0xff]  ;;  %v1270_v18 = vld [vmem:[%s2646_s3 + $0xd0] sm:$0xff] }
  0x4a   : > { %425 = vmatpush.msra.mxu0 %v344_v47  ;;  %617 = vmatpush.msra.mxu3 %v577_v9  ;;  %v573_v19 = vld [vmem:[%s2646_s3 + $0x50] sm:$0xff]  ;;  %v317_v20 = vld [vmem:[%s1757_s17 + $0x60] sm:$0xff]  ;;  %v320_v21 = vld [vmem:[%s1757_s17 + $0x78] sm:$0xff] }
  0x4b   : > { %495 = vmatpush.msra.mxu1 %v355_v50  ;;  %598 = vmatpush.msra.mxu2 %v1273_v12  ;;  %v1269_v22 = vld [vmem:[%s2646_s3 + $0xc8] sm:$0xff]  ;;  %v1268_v24 = vld [vmem:[%s2646_s3 + $0xc0] sm:$0xff]  ;;  %v1267_v26 = vld [vmem:[%s2646_s3 + $0xb8] sm:$0xff] }
  0x4c   : > { %426 = vmatpush.msra.mxu0 %v343_v49  ;;  %618 = vmatpush.msra.mxu3 %v576_v13  ;;  %v572_v23 = vld [vmem:[%s2646_s3 + $0x48] sm:$0xff]  ;;  %v571_v25 = vld [vmem:[%s2646_s3 + $0x40] sm:$0xff]  ;;  %v570_v27 = vld [vmem:[%s2646_s3 + $0x38] sm:$0xff] }
  0x4d   : > { %496 = vmatpush.msra.mxu1 %v354_v52  ;;  %599 = vmatpush.msra.mxu2 %v1272_v14  ;;  %v1266_v28 = vld [vmem:[%s2646_s3 + $0xb0] sm:$0xff]  ;;  %v322_v31 = vld [vmem:[%s1757_s17 + $0x88] sm:$0xff]  ;;  %v1264_v34 = vld [vmem:[%s2646_s3 + $0xa0] sm:$0xff] }
  0x4e   : > { %427 = vmatpush.msra.mxu0 %v342_v51  ;;  %619 = vmatpush.msra.mxu3 %v575_v15  ;;  %v569_v29 = vld [vmem:[%s2646_s3 + $0x30] sm:$0xff]  ;;  %v1265_v32 = vld [vmem:[%s2646_s3 + $0xa8] sm:$0xff]  ;;  %v567_v35 = vld [vmem:[%s2646_s3 + $0x20] sm:$0xff] }
  0x4f   : > { %497 = vmatpush.msra.mxu1 %v353_v54  ;;  %600 = vmatpush.msra.mxu2 %v1271_v16  ;;  %v319_v30 = vld [vmem:[%s1757_s17 + $0x70] sm:$0xff]  ;;  %v568_v33 = vld [vmem:[%s2646_s3 + $0x28] sm:$0xff]  ;;  %v1263_v36 = vld [vmem:[%s2646_s3 + $0x98] sm:$0xff] }
  0x50   : > { %428 = vmatpush.msra.mxu0 %v341_v53  ;;  %1244 = vmatmul.msk.f32.vlgmr.msra.gmra.mxu1 %vm368_vm0, %v306_v55  ;;  %v566_v37 = vld [vmem:[%s2646_s3 + $0x18] sm:$0xff]  ;;  %v1262_v38 = vld [vmem:[%s2646_s3 + $0x90] sm:$0xff]  ;;  %v321_v40 = vld [vmem:[%s1757_s17 + $0x80] sm:$0xff] }
  0x51   : > { %620 = vmatpush.msra.mxu3 %v574_v17  ;;  %601 = vmatpush.msra.mxu2 %v1270_v18  ;;  %v565_v39 = vld [vmem:[%s2646_s3 + $0x10] sm:$0xff]  ;;  %v324_v41 = vld [vmem:[%s1757_s17 + $0x98] sm:$0xff]  ;;  %v1261_v42 = vld [vmem:[%s2646_s3 + $0x88] sm:$0xff] }
  0x52   : > { %429 = vmatpush.msra.mxu0 %v340_v56  ;;  %v564_v43 = vld [vmem:[%s2646_s3 + $0x8] sm:$0xff]  ;;  %v1260_v44 = vld [vmem:[%s2646_s3 + $0x80] sm:$0xff]  ;;  %v1291_v46 = vld [vmem:[%s2646_s3 + $0x178] sm:$0xff] }
  0x53   : > { %621 = vmatpush.msra.mxu3 %v573_v19  ;;  %602 = vmatpush.msra.mxu2 %v1269_v22  ;;  %v563_v45 = vld [vmem:[%s2646_s3] sm:$0xff]  ;;  %v1307_v47 = vld [vmem:[%s2646_s3 + $0x1f8] sm:$0xff]  ;;  %v1290_v48 = vld [vmem:[%s2646_s3 + $0x170] sm:$0xff] }
  0x54   : > { %430 = vmatpush.msra.mxu0 %v339_v57  ;;  %v1306_v49 = vld [vmem:[%s2646_s3 + $0x1f0] sm:$0xff]  ;;  %v326_v51 = vld [vmem:[%s1757_s17 + $0xa8] sm:$0xff]  ;;  %v1288_v54 = vld [vmem:[%s2646_s3 + $0x160] sm:$0xff] }
  0x55   : > { %622 = vmatpush.msra.mxu3 %v572_v23  ;;  %603 = vmatpush.msra.mxu2 %v1268_v24  ;;  %v323_v50 = vld [vmem:[%s1757_s17 + $0x90] sm:$0xff]  ;;  %v1289_v52 = vld [vmem:[%s2646_s3 + $0x168] sm:$0xff]  ;;  %v1304_v55 = vld [vmem:[%s2646_s3 + $0x1e0] sm:$0xff] }
  0x56   : > { %431 = vmatpush.msra.mxu0 %v338_v58  ;;  %v1305_v53 = vld [vmem:[%s2646_s3 + $0x1e8] sm:$0xff]  ;;  %v1287_v56 = vld [vmem:[%s2646_s3 + $0x158] sm:$0xff]  ;;  %v1286_v58 = vld [vmem:[%s2646_s3 + $0x150] sm:$0xff] }
  0x57   : > { %623 = vmatpush.msra.mxu3 %v571_v25  ;;  %604 = vmatpush.msra.mxu2 %v1267_v26  ;;  %v1303_v57 = vld [vmem:[%s2646_s3 + $0x1d8] sm:$0xff]  ;;  %v329_v6 = vld [vmem:[%s1757_s17 + $0xc0] sm:$0xff]  ;;  %v1282_v8 = vld [vmem:[%s2646_s3 + $0x130] sm:$0xff] }
  0x58   : > { %432 = vmatpush.msra.mxu0 %v337_v59  ;;  %1245 = vmatmul.msk.f32.gmra.mxu1 %vm368_vm0, %v308_v61  ;;  %v1302_v59 = vld [vmem:[%s2646_s3 + $0x1d0] sm:$0xff]  ;;  %v328_v61 = vld [vmem:[%s1757_s17 + $0xb8] sm:$0xff]  ;;  %v1280_v13 = vld [vmem:[%s2646_s3 + $0x120] sm:$0xff] }
  0x59   : > { %433 = vmatmul.f32.vlgmr.msra.gmra.mxu0 %v305_v60  ;;  %624 = vmatpush.msra.mxu3 %v570_v27  ;;  %v325_v60 = vld [vmem:[%s1757_s17 + $0xa0] sm:$0xff]  ;;  %v332_v7 = vld [vmem:[%s1757_s17 + $0xd8] sm:$0xff]  ;;  %v1298_v9 = vld [vmem:[%s2646_s3 + $0x1b0] sm:$0xff] }
  0x5a   : > { %605 = vmatpush.msra.mxu2 %v1266_v28  ;;  %v1387_v12 = vld [vmem:[%s2646_s3 + $0x478] sm:$0xff]  ;;  %v1296_v14 = vld [vmem:[%s2646_s3 + $0x1a0] sm:$0xff]  ;;  %v331_v18 = vld [vmem:[%s1757_s17 + $0xd0] sm:$0xff] }
  0x5b   : > { %625 = vmatpush.msra.mxu3 %v569_v29  ;;  %881 = vmatpush.msrb.mxu1 %v1387_v12  ;;  %v1403_v15 = vld [vmem:[%s2646_s3 + $0x4f8] sm:$0xff]  ;;  %v334_v19 = vld [vmem:[%s1757_s17 + $0xe8] sm:$0xff]  ;;  %v1386_v24 = vld [vmem:[%s2646_s3 + $0x470] sm:$0xff] }
  0x5c   : > { %606 = vmatpush.msra.mxu2 %v1265_v32  ;;  %v1279_v16 = vld [vmem:[%s2646_s3 + $0x118] sm:$0xff]  ;;  %919 = vmatpush.msrb.mxu0 %v1403_v15  ;;  %v1277_v22 = vld [vmem:[%s2646_s3 + $0x108] sm:$0xff]  ;;  %v1276_v25 = vld [vmem:[%s2646_s3 + $0x100] sm:$0xff] }
  0x5d   : > { %626 = vmatpush.msra.mxu3 %v568_v33  ;;  %v1295_v17 = vld [vmem:[%s2646_s3 + $0x198] sm:$0xff]  ;;  %v1293_v23 = vld [vmem:[%s2646_s3 + $0x188] sm:$0xff]  ;;  %v1292_v26 = vld [vmem:[%s2646_s3 + $0x180] sm:$0xff]  ;;  %882 = vmatpush.msrb.mxu1 %v1386_v24 }
  0x5e   : > { %607 = vmatpush.msra.mxu2 %v1264_v34  ;;  %v333_v27 = vld [vmem:[%s1757_s17 + $0xe0] sm:$0xff]  ;;  %v336_v28 = vld [vmem:[%s1757_s17 + $0xf8] sm:$0xff]  ;;  %v1402_v29 = vld [vmem:[%s2646_s3 + $0x4f0] sm:$0xff] }
  0x5f   : > { %627 = vmatpush.msra.mxu3 %v567_v35  ;;  %920 = vmatpush.msrb.mxu0 %v1402_v29  ;;  %v335_v32 = vld [vmem:[%s1757_s17 + $0xf0] sm:$0xff]  ;;  %v1401_v33 = vld [vmem:[%s2646_s3 + $0x4e8] sm:$0xff]  ;;  %v2032_v34 = vld [vmem:[%s2645_s2] ss:$0 sm:$0xff] }
  0x60   : > { %1246 = vmatmul.msk.f32.gmra.mxu1 %vm368_vm0, %v310_v63  ;;  %608 = vmatpush.msra.mxu2 %v1263_v36  ;;  %v1301_v63 = vld [vmem:[%s2646_s3 + $0x1c8] sm:$0xff]  ;;  %v1384_v35 = vld [vmem:[%s2646_s3 + $0x460] sm:$0xff] }
  0x61   : > { %436 = vmatmul.f32.gmra.mxu0 %v307_v62  ;;  %628 = vmatpush.msra.mxu3 %v566_v37  ;;  %v1285_v62 = vld [vmem:[%s2646_s3 + $0x148] sm:$0xff] }
  0x62   : > { %609 = vmatpush.msra.mxu2 %v1262_v38  ;;  %921 = vmatpush.msrb.mxu0 %v1401_v33  ;;  %v1400_v38 = vld [vmem:[%s2646_s3 + $0x4e0] sm:$0xff]  ;;  %v1311_v33 = vld [vmem:[%s2646_s3 + $0x218] sm:$0xff] }
  0x63   : > { %629 = vmatpush.msra.mxu3 %v565_v39 }
  0x64   : > { %610 = vmatpush.msra.mxu2 %v1261_v42  ;;  %922 = vmatpush.msrb.mxu0 %v1400_v38  ;;  %v1339_v42 = vld [vmem:[%s2646_s3 + $0x2f8] sm:$0xff]  ;;  %v1310_v38 = vld [vmem:[%s2646_s3 + $0x210] sm:$0xff] }
  0x65   : > { %630 = vmatpush.msra.mxu3 %v564_v43  ;;  %v1383_v43 = vld [vmem:[%s2646_s3 + $0x458] sm:$0xff] }
  0x66   : > { %611 = vmatpush.msra.mxu2 %v1260_v44  ;;  %v1338_v44 = vld [vmem:[%s2646_s3 + $0x2f0] sm:$0xff] }
  0x67   : > { %631 = vmatpush.msra.mxu3 %v563_v45 }
  0x68   : > { %1247 = vmatmul.msk.f32.gmra.mxu1 %vm368_vm0, %v312_v1  ;;  %653 = vmatpush.msrb.mxu2 %v1291_v46  ;;  %v1300_v1 = vld [vmem:[%s2646_s3 + $0x1c0] sm:$0xff] }
  0x69   : > { %439 = vmatmul.f32.gmra.mxu0 %v309_v0  ;;  %691 = vmatpush.msrb.mxu3 %v1307_v47  ;;  %v1284_v0 = vld [vmem:[%s2646_s3 + $0x140] sm:$0xff]  ;;  %v1399_v47 = vld [vmem:[%s2646_s3 + $0x4d8] sm:$0xff] }
  0x6a   : > { %654 = vmatpush.msrb.mxu2 %v1290_v48  ;;  %923 = vmatpush.msrb.mxu0 %v1399_v47 }
  0x6b   : > { %692 = vmatpush.msrb.mxu3 %v1306_v49  ;;  %v1337_v49 = vld [vmem:[%s2646_s3 + $0x2e8] sm:$0xff] }
  0x6c   : > { %655 = vmatpush.msrb.mxu2 %v1289_v52 }
  0x6d   : > { %693 = vmatpush.msrb.mxu3 %v1305_v53  ;;  %v1323_v53 = vld [vmem:[%s2646_s3 + $0x278] sm:$0xff] }
  0x6e   : > { %656 = vmatpush.msrb.mxu2 %v1288_v54  ;;  %v1335_v54 = vld [vmem:[%s2646_s3 + $0x2d8] sm:$0xff] }
  0x6f   : > { %694 = vmatpush.msrb.mxu3 %v1304_v55  ;;  %v1382_v55 = vld [vmem:[%s2646_s3 + $0x450] sm:$0xff] }
  0x70   : > { %1248 = vmatmul.msk.f32.gmra.mxu1 %vm368_vm0, %v314_v3  ;;  %657 = vmatpush.msrb.mxu2 %v1287_v56  ;;  %v330_v3 = vld [vmem:[%s1757_s17 + $0xc8] sm:$0xff]  ;;  %v1322_v56 = vld [vmem:[%s2646_s3 + $0x270] sm:$0xff] }
  0x71   : > { %442 = vmatmul.f32.gmra.mxu0 %v311_v2  ;;  %695 = vmatpush.msrb.mxu3 %v1303_v57  ;;  %v327_v2 = vld [vmem:[%s1757_s17 + $0xb0] sm:$0xff] }
  0x72   : > { %658 = vmatpush.msrb.mxu2 %v1286_v58  ;;  %v1334_v57 = vld [vmem:[%s2646_s3 + $0x2d0] sm:$0xff] }
  0x73   : > { %696 = vmatpush.msrb.mxu3 %v1302_v59 }
  0x74   : > { %659 = vmatpush.msrb.mxu2 %v1285_v62  ;;  %v1321_v62 = vld [vmem:[%s2646_s3 + $0x268] sm:$0xff] }
  0x75   : > { %697 = vmatpush.msrb.mxu3 %v1301_v63  ;;  %v1333_v63 = vld [vmem:[%s2646_s3 + $0x2c8] sm:$0xff] }
  0x76   : > { %660 = vmatpush.msrb.mxu2 %v1284_v0 }
  0x77   : > { %698 = vmatpush.msrb.mxu3 %v1300_v1  ;;  %v1320_v1 = vld [vmem:[%s2646_s3 + $0x260] sm:$0xff] }
  0x78   : > { %1249 = vmatmul.msk.f32.gmra.mxu1 %vm368_vm0, %v316_v5  ;;  %v1299_v5 = vld [vmem:[%s2646_s3 + $0x1b8] sm:$0xff] }
  0x79   : > { %445 = vmatmul.f32.gmra.mxu0 %v313_v4  ;;  %v1283_v4 = vld [vmem:[%s2646_s3 + $0x138] sm:$0xff]  ;;  %699 = vmatpush.msrb.mxu3 %v1299_v5 }
  0x7a   : > { %661 = vmatpush.msrb.mxu2 %v1283_v4  ;;  %v1319_v4 = vld [vmem:[%s2646_s3 + $0x258] sm:$0xff] }
  0x7b   : > { %700 = vmatpush.msrb.mxu3 %v1298_v9  ;;  %v1331_v5 = vld [vmem:[%s2646_s3 + $0x2b8] sm:$0xff] }
  0x7c   : > { %662 = vmatpush.msrb.mxu2 %v1282_v8  ;;  %v1330_v8 = vld [vmem:[%s2646_s3 + $0x2b0] sm:$0xff] }
  0x80   : > { %1250 = vmatmul.msk.f32.gmra.mxu1 %vm368_vm0, %v318_v11  ;;  %v1297_v11 = vld [vmem:[%s2646_s3 + $0x1a8] sm:$0xff] }
  0x81   : > { %448 = vmatmul.f32.gmra.mxu0 %v315_v10  ;;  %v1281_v10 = vld [vmem:[%s2646_s3 + $0x128] sm:$0xff]  ;;  %701 = vmatpush.msrb.mxu3 %v1297_v11 }
  0x82   : > { %663 = vmatpush.msrb.mxu2 %v1281_v10  ;;  %v1397_v11 = vld [vmem:[%s2646_s3 + $0x4c8] sm:$0xff] }
  0x83   : > { %702 = vmatpush.msrb.mxu3 %v1296_v14  ;;  %v1329_v14 = vld [vmem:[%s2646_s3 + $0x2a8] sm:$0xff] }
  0x84   : > { %664 = vmatpush.msrb.mxu2 %v1280_v13  ;;  %v1317_v13 = vld [vmem:[%s2646_s3 + $0x248] sm:$0xff] }
  0x85   : > { %703 = vmatpush.msrb.mxu3 %v1295_v17  ;;  %v1328_v17 = vld [vmem:[%s2646_s3 + $0x2a0] sm:$0xff] }
  0x86   : > { %665 = vmatpush.msrb.mxu2 %v1279_v16  ;;  %v1316_v16 = vld [vmem:[%s2646_s3 + $0x240] sm:$0xff] }
  0x88   : > { %1251 = vmatmul.msk.f32.gmra.mxu1 %vm368_vm0, %v320_v21  ;;  %v1294_v21 = vld [vmem:[%s2646_s3 + $0x190] sm:$0xff] }
  0x89   : > { %451 = vmatmul.f32.gmra.mxu0 %v317_v20  ;;  %v1278_v20 = vld [vmem:[%s2646_s3 + $0x110] sm:$0xff]  ;;  %704 = vmatpush.msrb.mxu3 %v1294_v21  ;;  %v1380_v21 = vld [vmem:[%s2646_s3 + $0x440] sm:$0xff] }
  0x8a   : > { %666 = vmatpush.msrb.mxu2 %v1278_v20  ;;  %v1327_v20 = vld [vmem:[%s2646_s3 + $0x298] sm:$0xff] }
  0x8b   : > { %705 = vmatpush.msrb.mxu3 %v1293_v23  ;;  %v1326_v23 = vld [vmem:[%s2646_s3 + $0x290] sm:$0xff] }
  0x8c   : > { %667 = vmatpush.msrb.mxu2 %v1277_v22  ;;  %v1314_v22 = vld [vmem:[%s2646_s3 + $0x230] sm:$0xff] }
  0x8d   : > { %706 = vmatpush.msrb.mxu3 %v1292_v26  ;;  %v1396_v26 = vld [vmem:[%s2646_s3 + $0x4c0] sm:$0xff] }
  0x8e   : > { %668 = vmatpush.msrb.mxu2 %v1276_v25 }
  0x90   : > { %1252 = vmatmul.msk.f32.gmra.mxu1 %vm368_vm0, %v322_v31 }
  0x91   : > { %454 = vmatmul.f32.gmra.mxu0 %v319_v30  ;;  %v1385_v30 = vld [vmem:[%s2646_s3 + $0x468] sm:$0xff] }
  0x92   : > { %883 = vmatpush.msrb.mxu1 %v1385_v30  ;;  %v1312_v30 = vld [vmem:[%s2646_s3 + $0x220] sm:$0xff] }
  0x94   : > { %884 = vmatpush.msrb.mxu1 %v1384_v35  ;;  %v1370_v35 = vld [vmem:[%s2646_s3 + $0x3f0] sm:$0xff] }
  0x96   : > { %885 = vmatpush.msrb.mxu1 %v1383_v43 }
  0x98   : > { %1253 = vmatmul.msk.f32.gmra.mxu1 %vm368_vm0, %v324_v41 }
  0x99   : > { %457 = vmatmul.f32.gmra.mxu0 %v321_v40  ;;  %886 = vmatpush.msrb.mxu1 %v1382_v55  ;;  %v1394_v55 = vld [vmem:[%s2646_s3 + $0x4b0] sm:$0xff] }
  0xa0   : > { %1254 = vmatmul.msk.f32.gmra.mxu1 %vm368_vm0, %v326_v51  ;;  %v1336_v51 = vld [vmem:[%s2646_s3 + $0x2e0] sm:$0xff] }
  0xa1   : > { %460 = vmatmul.f32.gmra.mxu0 %v323_v50 }
  0xa8   : > { %1255 = vmatmul.msk.f32.gmra.mxu1 %vm368_vm0, %v328_v61 }
  0xa9   : > { %463 = vmatmul.f32.gmra.mxu0 %v325_v60  ;;  %v1398_v60 = vld [vmem:[%s2646_s3 + $0x4d0] sm:$0xff] }
  0xaa   : > { %924 = vmatpush.msrb.mxu0 %v1398_v60  ;;  %v1375_v60 = vld [vmem:[%s2646_s3 + $0x418] sm:$0xff] }
  0xac   : > { %925 = vmatpush.msrb.mxu0 %v1397_v11  ;;  %v1362_v11 = vld [vmem:[%s2646_s3 + $0x3b0] sm:$0xff] }
  0xae   : > { %926 = vmatpush.msrb.mxu0 %v1396_v26  ;;  %v1359_v26 = vld [vmem:[%s2646_s3 + $0x398] sm:$0xff] }
  0xb0   : > { %1256 = vmatmul.msk.f32.gmra.mxu1 %vm368_vm0, %v330_v3 }
  0xb1   : > { %466 = vmatmul.f32.gmra.mxu0 %v327_v2  ;;  %v1332_v2 = vld [vmem:[%s2646_s3 + $0x2c0] sm:$0xff] }
  0xb8   : > { %1257 = vmatmul.msk.f32.gmra.mxu1 %vm368_vm0, %v332_v7  ;;  %v1318_v7 = vld [vmem:[%s2646_s3 + $0x250] sm:$0xff] }
  0xb9   : > { %469 = vmatmul.f32.gmra.mxu0 %v329_v6  ;;  %v1381_v6 = vld [vmem:[%s2646_s3 + $0x448] sm:$0xff] }
  0xba   : > { %887 = vmatpush.msrb.mxu1 %v1381_v6  ;;  %v1351_v6 = vld [vmem:[%s2646_s3 + $0x358] sm:$0xff] }
  0xbc   : > { %888 = vmatpush.msrb.mxu1 %v1380_v21 }
  0xc0   : > { %1258 = vmatmul.msk.f32.gmra.mxu1 %vm368_vm0, %v334_v19  ;;  %v1315_v19 = vld [vmem:[%s2646_s3 + $0x238] sm:$0xff] }
  0xc1   : > { %472 = vmatmul.f32.gmra.mxu0 %v331_v18 }
  0xc8   : > { %1259 = vmatmul.msk.f32.gmra.mxu1 %vm368_vm0, %v336_v28  ;;  %v1325_v28 = vld [vmem:[%s2646_s3 + $0x288] sm:$0xff] }
  0xc9   : > { %475 = vmatmul.f32.gmra.mxu0 %v333_v27  ;;  %v1313_v27 = vld [vmem:[%s2646_s3 + $0x228] sm:$0xff] }
  0xcd   : > { %v499_v31 = vpop.f32.mrf.mxu1 }
  0xd1   : > { %478 = vmatmul.f32.gmra.mxu0 %v335_v32  ;;  %v1371_v32 = vld [vmem:[%s2646_s3 + $0x3f8] sm:$0xff] }
  0xd5   : > { %v502_v37 = vpop.f32.mrf.mxu1 }
  0xd6   : > { %v434_v36 = vpop.f32.mrf.mxu0 }
  0xd7   : > { %v435_v39 = vadd.f32 %v2032_v34, %v434_v36  ;;  %v1379_v36 = vld [vmem:[%s2646_s3 + $0x438] sm:$0xff] }
  0xd8   : > { %889 = vmatpush.msrb.mxu1 %v1379_v36  ;;  %v1447_v36 = vld [vmem:[%s2646_s3 + $0x658] sm:$0xff] }
  0xd9   : > { %v500_v40 = vadd.f32 %v499_v31, %v435_v39  ;;  %v1324_v31 = vld [vmem:[%s2646_s3 + $0x280] sm:$0xff] }
  0xdb   : > { %v547_v41 = vmax.f32 %v500_v40, 0.0  ;;  %v1369_v40 = vld [vmem:[%s2646_s3 + $0x3e8] sm:$0xff] }
  0xdd   : > { %632 = vmatmul.f32.vlgmr.msra.gmra.mxu3 %v547_v41  ;;  %v505_v46 = vpop.f32.mrf.mxu1 }
  0xde   : > { %v437_v45 = vpop.f32.mrf.mxu0  ;;  %767 = vmatpush.msra.mxu3 %v1339_v42  ;;  %v1395_v42 = vld [vmem:[%s2646_s3 + $0x4b8] sm:$0xff] }
  0xdf   : > { %v438_v48 = vadd.f32 %v2032_v34, %v437_v45  ;;  %927 = vmatpush.msrb.mxu0 %v1395_v42  ;;  %v1378_v45 = vld [vmem:[%s2646_s3 + $0x430] sm:$0xff] }
  0xe0   : > { %768 = vmatpush.msra.mxu3 %v1338_v44  ;;  %v1309_v44 = vld [vmem:[%s2646_s3 + $0x208] sm:$0xff]  ;;  %890 = vmatpush.msrb.mxu1 %v1378_v45  ;;  %v1446_v42 = vld [vmem:[%s2646_s3 + $0x650] sm:$0xff] }
  0xe1   : > { %v503_v50 = vadd.f32 %v502_v37, %v438_v48  ;;  %928 = vmatpush.msrb.mxu0 %v1394_v55  ;;  %v1434_v55 = vld [vmem:[%s2646_s3 + $0x5f0] sm:$0xff] }
  0xe2   : > { %769 = vmatpush.msra.mxu3 %v1337_v49  ;;  %v1308_v49 = vld [vmem:[%s2646_s3 + $0x200] sm:$0xff] }
  0xe3   : > { %v548_v52 = vmax.f32 %v503_v50, 0.0  ;;  %v1377_v50 = vld [vmem:[%s2646_s3 + $0x428] sm:$0xff] }
  0xe4   : > { %770 = vmatpush.msra.mxu3 %v1336_v51  ;;  %891 = vmatpush.msrb.mxu1 %v1377_v50 }
  0xe5   : > { %612 = vmatmul.f32.vlgmr.msra.gmra.mxu2 %v548_v52  ;;  %v508_v59 = vpop.f32.mrf.mxu1  ;;  %v1355_v52 = vld [vmem:[%s2646_s3 + $0x378] sm:$0xff] }
  0xe6   : > { %729 = vmatpush.msra.mxu2 %v1323_v53  ;;  %v440_v58 = vpop.f32.mrf.mxu0  ;;  %771 = vmatpush.msra.mxu3 %v1335_v54  ;;  %v1367_v53 = vld [vmem:[%s2646_s3 + $0x3d8] sm:$0xff]  ;;  %v1376_v54 = vld [vmem:[%s2646_s3 + $0x420] sm:$0xff] }
  0xe7   : > { %v441_v61 = vadd.f32 %v2032_v34, %v440_v58  ;;  %892 = vmatpush.msrb.mxu1 %v1376_v54  ;;  %v1342_v54 = vld [vmem:[%s2646_s3 + $0x310] sm:$0xff] }
  0xe8   : > { %730 = vmatpush.msra.mxu2 %v1322_v56  ;;  %772 = vmatpush.msra.mxu3 %v1334_v57  ;;  %v1354_v56 = vld [vmem:[%s2646_s3 + $0x370] sm:$0xff] }
  0xe9   : > { %v506_v0 = vadd.f32 %v505_v46, %v441_v61  ;;  %v1368_v46 = vld [vmem:[%s2646_s3 + $0x3e0] sm:$0xff]  ;;  %v1366_v57 = vld [vmem:[%s2646_s3 + $0x3d0] sm:$0xff]  ;;  %v1393_v61 = vld [vmem:[%s2646_s3 + $0x4a8] sm:$0xff]  ;;  %893 = vmatpush.msrb.mxu1 %v1375_v60 }
  0xea   : > { %731 = vmatpush.msra.mxu2 %v1321_v62  ;;  %773 = vmatpush.msra.mxu3 %v1333_v63  ;;  %v1353_v62 = vld [vmem:[%s2646_s3 + $0x368] sm:$0xff] }
  0xeb   : > { %v549_v3 = vmax.f32 %v506_v0, 0.0  ;;  %v1365_v63 = vld [vmem:[%s2646_s3 + $0x3c8] sm:$0xff]  ;;  %v1374_v0 = vld [vmem:[%s2646_s3 + $0x410] sm:$0xff]  ;;  %929 = vmatpush.msrb.mxu0 %v1393_v61 }
  0xec   : > { %732 = vmatpush.msra.mxu2 %v1320_v1  ;;  %774 = vmatpush.msra.mxu3 %v1332_v2  ;;  %v1392_v1 = vld [vmem:[%s2646_s3 + $0x4a0] sm:$0xff]  ;;  %v1341_v60 = vld [vmem:[%s2646_s3 + $0x308] sm:$0xff] }
  0xed   : > { %669 = vmatmul.f32.vlgmr.msrb.gmra.mxu2 %v549_v3  ;;  %v511_v10 = vpop.f32.mrf.mxu1  ;;  %v1352_v2 = vld [vmem:[%s2646_s3 + $0x360] sm:$0xff]  ;;  %894 = vmatpush.msrb.mxu1 %v1374_v0  ;;  %v1442_v0 = vld [vmem:[%s2646_s3 + $0x630] sm:$0xff] }
  0xee   : > { %733 = vmatpush.msra.mxu2 %v1319_v4  ;;  %v443_v9 = vpop.f32.mrf.mxu0  ;;  %775 = vmatpush.msra.mxu3 %v1331_v5  ;;  %v1364_v3 = vld [vmem:[%s2646_s3 + $0x3c0] sm:$0xff]  ;;  %v1373_v4 = vld [vmem:[%s2646_s3 + $0x408] sm:$0xff]  ;;  %v1391_v5 = vld [vmem:[%s2646_s3 + $0x498] sm:$0xff] }
  0xef   : > { %v444_v12 = vadd.f32 %v2032_v34, %v443_v9  ;;  %930 = vmatpush.msrb.mxu0 %v1392_v1  ;;  %895 = vmatpush.msrb.mxu1 %v1373_v4  ;;  %v1390_v9 = vld [vmem:[%s2646_s3 + $0x490] sm:$0xff]  ;;  %v1340_v1 = vld [vmem:[%s2646_s3 + $0x300] sm:$0xff] }
  0xf0   : > { %734 = vmatpush.msra.mxu2 %v1318_v7  ;;  %776 = vmatpush.msra.mxu3 %v1330_v8  ;;  %v1363_v7 = vld [vmem:[%s2646_s3 + $0x3b8] sm:$0xff]  ;;  %v1372_v8 = vld [vmem:[%s2646_s3 + $0x400] sm:$0xff] }
  0xf1   : > { %v509_v15 = vadd.f32 %v508_v59, %v444_v12  ;;  %931 = vmatpush.msrb.mxu0 %v1391_v5  ;;  %896 = vmatpush.msrb.mxu1 %v1372_v8  ;;  %v1419_v5 = vld [vmem:[%s2646_s3 + $0x578] sm:$0xff]  ;;  %v1460_v8 = vld [vmem:[%s2646_s3 + $0x6c0] sm:$0xff] }
  0xf2   : > { %735 = vmatpush.msra.mxu2 %v1317_v13  ;;  %777 = vmatpush.msra.mxu3 %v1329_v14  ;;  %v1389_v14 = vld [vmem:[%s2646_s3 + $0x488] sm:$0xff] }
  0xf3   : > { %v550_v18 = vmax.f32 %v509_v15, 0.0  ;;  %v1451_v15 = vld [vmem:[%s2646_s3 + $0x678] sm:$0xff]  ;;  %932 = vmatpush.msrb.mxu0 %v1390_v9  ;;  %v1441_v9 = vld [vmem:[%s2646_s3 + $0x628] sm:$0xff] }
  0xf4   : > { %736 = vmatpush.msra.mxu2 %v1316_v16  ;;  %778 = vmatpush.msra.mxu3 %v1328_v17  ;;  %v1349_v16 = vld [vmem:[%s2646_s3 + $0x348] sm:$0xff] }
  0xf5   : > { %707 = vmatmul.f32.vlgmr.msrb.gmra.mxu3 %v550_v18  ;;  %v514_v25 = vpop.f32.mrf.mxu1  ;;  %v1361_v17 = vld [vmem:[%s2646_s3 + $0x3a8] sm:$0xff]  ;;  %1033 = vmatpush.msra.mxu1 %v1451_v15  ;;  %v1388_v18 = vld [vmem:[%s2646_s3 + $0x480] sm:$0xff] }
  0xf6   : > { %737 = vmatpush.msra.mxu2 %v1315_v19  ;;  %v446_v24 = vpop.f32.mrf.mxu0  ;;  %779 = vmatpush.msra.mxu3 %v1327_v20  ;;  %v1450_v19 = vld [vmem:[%s2646_s3 + $0x670] sm:$0xff]  ;;  %v1348_v20 = vld [vmem:[%s2646_s3 + $0x340] sm:$0xff]  ;;  %v1417_v15 = vld [vmem:[%s2646_s3 + $0x568] sm:$0xff] }
  0xf7   : > { %v447_v29 = vadd.f32 %v2032_v34, %v446_v24  ;;  %933 = vmatpush.msrb.mxu0 %v1389_v14  ;;  %1034 = vmatpush.msra.mxu1 %v1450_v19  ;;  %v1449_v24 = vld [vmem:[%s2646_s3 + $0x668] sm:$0xff]  ;;  %v1440_v14 = vld [vmem:[%s2646_s3 + $0x620] sm:$0xff] }
  0xf8   : > { %738 = vmatpush.msra.mxu2 %v1314_v22  ;;  %780 = vmatpush.msra.mxu3 %v1326_v23  ;;  %v1360_v22 = vld [vmem:[%s2646_s3 + $0x3a0] sm:$0xff]  ;;  %v1467_v23 = vld [vmem:[%s2646_s3 + $0x6f8] sm:$0xff] }
  0xf9   : > { %v512_v37 = vadd.f32 %v511_v10, %v447_v29  ;;  %v1350_v10 = vld [vmem:[%s2646_s3 + $0x350] sm:$0xff]  ;;  %934 = vmatpush.msrb.mxu0 %v1388_v18  ;;  %1035 = vmatpush.msra.mxu1 %v1449_v24  ;;  %v1439_v18 = vld [vmem:[%s2646_s3 + $0x618] sm:$0xff]  ;;  %v1416_v19 = vld [vmem:[%s2646_s3 + $0x560] sm:$0xff] }
  0xfa   : > { %739 = vmatpush.msra.mxu2 %v1313_v27  ;;  %781 = vmatpush.msra.mxu3 %v1325_v28  ;;  %v1466_v27 = vld [vmem:[%s2646_s3 + $0x6f0] sm:$0xff]  ;;  %v1448_v28 = vld [vmem:[%s2646_s3 + $0x660] sm:$0xff]  ;;  %v1415_v24 = vld [vmem:[%s2646_s3 + $0x558] sm:$0xff] }
  0xfb   : > { %v551_v47 = vmax.f32 %v512_v37, 0.0  ;;  %v1346_v29 = vld [vmem:[%s2646_s3 + $0x330] sm:$0xff]  ;;  %1071 = vmatpush.msra.mxu0 %v1467_v23  ;;  %1036 = vmatpush.msra.mxu1 %v1448_v28  ;;  %v1345_v37 = vld [vmem:[%s2646_s3 + $0x328] sm:$0xff] }
  0xfc   : > { %740 = vmatpush.msra.mxu2 %v1312_v30  ;;  %782 = vmatpush.msra.mxu3 %v1324_v31  ;;  %v1358_v31 = vld [vmem:[%s2646_s3 + $0x390] sm:$0xff] }
  0xfd   : > { %v2171_v41 = vpop.f32.mrf.mxu1  ;;  %1072 = vmatpush.msra.mxu0 %v1466_v27  ;;  %1037 = vmatpush.msra.mxu1 %v1447_v36  ;;  %v1438_v23 = vld [vmem:[%s2646_s3 + $0x610] sm:$0xff]  ;;  %v1437_v27 = vld [vmem:[%s2646_s3 + $0x608] sm:$0xff] }
  0xfe   : > { %843 = vmatpush.msrb.mxu3 %v1371_v32  ;;  %741 = vmatpush.msra.mxu2 %v1311_v33  ;;  %v449_v39 = vpop.f32.mrf.mxu0  ;;  %v1414_v28 = vld [vmem:[%s2646_s3 + $0x550] sm:$0xff] }
  0xff   : > { %v450_v43 = vadd.f32 %v2032_v34, %v449_v39  ;;  %v1357_v39 = vld [vmem:[%s2646_s3 + $0x388] sm:$0xff]  ;;  %1038 = vmatpush.msra.mxu1 %v1446_v42  ;;  %v1454_v36 = vld [vmem:[%s2646_s3 + $0x690] sm:$0xff]  ;;  %v1411_v42 = vld [vmem:[%s2646_s3 + $0x538] sm:$0xff] }
 0x100   : > { %844 = vmatpush.msrb.mxu3 %v1370_v35  ;;  %742 = vmatpush.msra.mxu2 %v1310_v38  ;;  %v1465_v35 = vld [vmem:[%s2646_s3 + $0x6e8] sm:$0xff] }
 0x101   : > { %v515_v48 = vadd.f32 %v514_v25, %v450_v43  ;;  %v1347_v25 = vld [vmem:[%s2646_s3 + $0x338] sm:$0xff]  ;;  %1073 = vmatpush.msra.mxu0 %v1465_v35  ;;  %v1425_v35 = vld [vmem:[%s2646_s3 + $0x5a8] sm:$0xff] }
 0x102   : > { %845 = vmatpush.msrb.mxu3 %v1369_v40  ;;  %743 = vmatpush.msra.mxu2 %v1309_v44  ;;  %v1464_v40 = vld [vmem:[%s2646_s3 + $0x6e0] sm:$0xff] }
 0x103   : > { %v552_v51 = vmax.f32 %v515_v48, 0.0  ;;  %v1344_v44 = vld [vmem:[%s2646_s3 + $0x320] sm:$0xff]  ;;  %1074 = vmatpush.msra.mxu0 %v1464_v40  ;;  %v1453_v40 = vld [vmem:[%s2646_s3 + $0x688] sm:$0xff] }
 0x104   : > { %846 = vmatpush.msrb.mxu3 %v1368_v46  ;;  %744 = vmatpush.msra.mxu2 %v1308_v49  ;;  %v1356_v46 = vld [vmem:[%s2646_s3 + $0x380] sm:$0xff]  ;;  %v1343_v49 = vld [vmem:[%s2646_s3 + $0x318] sm:$0xff] }
 0x105   : > { %745 = vmatmul.f32.vlgmr.msra.gmra.mxu2 %v551_v47  ;;  %783 = vmatmul.f32.vlgmr.msra.gmra.mxu3 %v552_v51  ;;  %v2212_v59 = vpop.f32.mrf.mxu1  ;;  %v1445_v47 = vld [vmem:[%s2646_s3 + $0x648] sm:$0xff]  ;;  %v1435_v51 = vld [vmem:[%s2646_s3 + $0x5f8] sm:$0xff] }
 0x106   : > { %805 = vmatpush.msrb.mxu2 %v1355_v52  ;;  %847 = vmatpush.msrb.mxu3 %v1367_v53  ;;  %v2210_v58 = vpop.f32.mrf.mxu0  ;;  %v1463_v52 = vld [vmem:[%s2646_s3 + $0x6d8] sm:$0xff]  ;;  %v1444_v53 = vld [vmem:[%s2646_s3 + $0x640] sm:$0xff] }
 0x107   : > { %v453_v48 = vadd.f32 %v2032_v34, %v2210_v58  ;;  %1039 = vmatpush.msra.mxu1 %v1445_v47  ;;  %v1443_v58 = vld [vmem:[%s2646_s3 + $0x638] sm:$0xff]  ;;  %1075 = vmatpush.msra.mxu0 %v1463_v52  ;;  %v1421_v52 = vld [vmem:[%s2646_s3 + $0x588] sm:$0xff] }
 0x108   : > { %806 = vmatpush.msrb.mxu2 %v1354_v56  ;;  %848 = vmatpush.msrb.mxu3 %v1366_v57  ;;  %v1462_v57 = vld [vmem:[%s2646_s3 + $0x6d0] sm:$0xff] }
 0x109   : > { %1040 = vmatpush.msra.mxu1 %v1444_v53  ;;  %1076 = vmatpush.msra.mxu0 %v1462_v57 }
 0x10a   : > { %807 = vmatpush.msrb.mxu2 %v1353_v62  ;;  %849 = vmatpush.msrb.mxu3 %v1365_v63  ;;  %v1433_v62 = vld [vmem:[%s2646_s3 + $0x5e8] sm:$0xff] }
 0x10b   : > { %1041 = vmatpush.msra.mxu1 %v1443_v58  ;;  %v1407_v58 = vld [vmem:[%s2646_s3 + $0x518] sm:$0xff] }
 0x10c   : > { %808 = vmatpush.msrb.mxu2 %v1352_v2  ;;  %850 = vmatpush.msrb.mxu3 %v1364_v3  ;;  %v1432_v3 = vld [vmem:[%s2646_s3 + $0x5e0] sm:$0xff] }
 0x10d   : > { %v523_v13 = vpop.f32.mrf.mxu1  ;;  %1042 = vmatpush.msra.mxu1 %v1442_v0 }
 0x10e   : > { %809 = vmatpush.msrb.mxu2 %v1351_v6  ;;  %851 = vmatpush.msrb.mxu3 %v1363_v7  ;;  %v455_v12 = vpop.f32.mrf.mxu0  ;;  %v1431_v7 = vld [vmem:[%s2646_s3 + $0x5d8] sm:$0xff] }
 0x10f   : > { %v456_v21 = vadd.f32 %v2032_v34, %v455_v12  ;;  %1043 = vmatpush.msra.mxu1 %v1441_v9 }
 0x110   : > { %810 = vmatpush.msrb.mxu2 %v1350_v10  ;;  %852 = vmatpush.msrb.mxu3 %v1362_v11  ;;  %v1418_v10 = vld [vmem:[%s2646_s3 + $0x570] sm:$0xff] }
 0x111   : > { %v521_v30 = vadd.f32 %v2212_v59, %v456_v21  ;;  %v518_v59 = vadd.f32 %v2171_v41, %v453_v48  ;;  %v1461_v41 = vld [vmem:[%s2646_s3 + $0x6c8] sm:$0xff]  ;;  %v1430_v11 = vld [vmem:[%s2646_s3 + $0x5d0] sm:$0xff]  ;;  %1044 = vmatpush.msra.mxu1 %v1440_v14 }
 0x112   : > { %811 = vmatpush.msrb.mxu2 %v1349_v16  ;;  %853 = vmatpush.msrb.mxu3 %v1361_v17  ;;  %v1429_v16 = vld [vmem:[%s2646_s3 + $0x5c8] sm:$0xff]  ;;  %v1458_v17 = vld [vmem:[%s2646_s3 + $0x6b0] sm:$0xff] }
 0x113   : > { %v554_v43 = vmax.f32 %v521_v30, 0.0  ;;  %v553_v4 = vmax.f32 %v518_v59, 0.0  ;;  %1077 = vmatpush.msra.mxu0 %v1461_v41  ;;  %1045 = vmatpush.msra.mxu1 %v1439_v18  ;;  %v1422_v48 = vld [vmem:[%s2646_s3 + $0x590] sm:$0xff]  ;;  %v1481_v14 = vld [vmem:[%s2646_s3 + $0x768] sm:$0xff]  ;;  %v1492_v18 = vld [vmem:[%s2646_s3 + $0x7c0] sm:$0xff] }
 0x114   : > { %812 = vmatpush.msrb.mxu2 %v1348_v20  ;;  %854 = vmatpush.msrb.mxu3 %v1360_v22  ;;  %v1428_v20 = vld [vmem:[%s2646_s3 + $0x5c0] sm:$0xff]  ;;  %v1457_v22 = vld [vmem:[%s2646_s3 + $0x6a8] sm:$0xff] }
 0x115   : > { %v526_v33 = vpop.f32.mrf.mxu1  ;;  %1078 = vmatpush.msra.mxu0 %v1460_v8  ;;  %1046 = vmatpush.msra.mxu1 %v1438_v23  ;;  %v1483_v8 = vld [vmem:[%s2646_s3 + $0x778] sm:$0xff] }
 0x116   : > { %813 = vmatpush.msrb.mxu2 %v1347_v25  ;;  %855 = vmatpush.msrb.mxu3 %v1359_v26  ;;  %v458_v32 = vpop.f32.mrf.mxu0  ;;  %v1427_v25 = vld [vmem:[%s2646_s3 + $0x5b8] sm:$0xff]  ;;  %v1456_v26 = vld [vmem:[%s2646_s3 + $0x6a0] sm:$0xff] }
 0x117   : > { %v459_v38 = vadd.f32 %v2032_v34, %v458_v32  ;;  %v1436_v32 = vld [vmem:[%s2646_s3 + $0x600] sm:$0xff]  ;;  %1047 = vmatpush.msra.mxu1 %v1437_v27 }
 0x118   : > { %814 = vmatpush.msrb.mxu2 %v1346_v29  ;;  %856 = vmatpush.msrb.mxu3 %v1358_v31  ;;  %v1426_v29 = vld [vmem:[%s2646_s3 + $0x5b0] sm:$0xff]  ;;  %v1455_v31 = vld [vmem:[%s2646_s3 + $0x698] sm:$0xff]  ;;  %v1488_v27 = vld [vmem:[%s2646_s3 + $0x7a0] sm:$0xff] }
 0x119   : > { %v524_v45 = vadd.f32 %v523_v13, %v459_v38  ;;  %v1459_v13 = vld [vmem:[%s2646_s3 + $0x6b8] sm:$0xff]  ;;  %1048 = vmatpush.msra.mxu1 %v1436_v32  ;;  %v1474_v32 = vld [vmem:[%s2646_s3 + $0x730] sm:$0xff] }
 0x11a   : > { %815 = vmatpush.msrb.mxu2 %v1345_v37  ;;  %857 = vmatpush.msrb.mxu3 %v1357_v39  ;;  %v1412_v37 = vld [vmem:[%s2646_s3 + $0x540] sm:$0xff] }
 0x11b   : > { %v555_v50 = vmax.f32 %v524_v45, 0.0  ;;  %1079 = vmatpush.msra.mxu0 %v1459_v13  ;;  %v1424_v39 = vld [vmem:[%s2646_s3 + $0x5a0] sm:$0xff] }
 0x11c   : > { %816 = vmatpush.msrb.mxu2 %v1344_v44  ;;  %858 = vmatpush.msrb.mxu3 %v1356_v46  ;;  %v1452_v45 = vld [vmem:[%s2646_s3 + $0x680] sm:$0xff]  ;;  %v1410_v46 = vld [vmem:[%s2646_s3 + $0x530] sm:$0xff] }
 0x11d   : > { %859 = vmatmul.f32.vlgmr.msrb.gmra.mxu3 %v554_v43  ;;  %897 = vmatmul.f32.vlgmr.msrb.gmra.mxu1 %v555_v50  ;;  %v2374_v63 = vpop.f32.mrf.mxu1  ;;  %v1423_v43 = vld [vmem:[%s2646_s3 + $0x598] sm:$0xff]  ;;  %v1409_v50 = vld [vmem:[%s2646_s3 + $0x528] sm:$0xff] }
 0x11e   : > { %817 = vmatpush.msrb.mxu2 %v1343_v49  ;;  %995 = vmatpush.msra.mxu3 %v1435_v51  ;;  %v461_v56 = vpop.f32.mrf.mxu0 }
 0x11f   : > { %v462_v61 = vadd.f32 %v2032_v34, %v461_v56  ;;  %1080 = vmatpush.msra.mxu0 %v1458_v17  ;;  %v1420_v56 = vld [vmem:[%s2646_s3 + $0x580] sm:$0xff] }
 0x120   : > { %818 = vmatpush.msrb.mxu2 %v1342_v54  ;;  %996 = vmatpush.msra.mxu3 %v1434_v55  ;;  %v1408_v54 = vld [vmem:[%s2646_s3 + $0x520] sm:$0xff] }
 0x121   : > { %v527_v2 = vadd.f32 %v526_v33, %v462_v61  ;;  %1081 = vmatpush.msra.mxu0 %v1457_v22  ;;  %v1413_v33 = vld [vmem:[%s2646_s3 + $0x548] sm:$0xff]  ;;  %v1406_v61 = vld [vmem:[%s2646_s3 + $0x510] sm:$0xff]  ;;  %v1480_v17 = vld [vmem:[%s2646_s3 + $0x760] sm:$0xff] }
 0x122   : > { %819 = vmatpush.msrb.mxu2 %v1341_v60  ;;  %997 = vmatpush.msra.mxu3 %v1433_v62  ;;  %v1499_v60 = vld [vmem:[%s2646_s3 + $0x7f8] sm:$0xff]  ;;  %v1498_v62 = vld [vmem:[%s2646_s3 + $0x7f0] sm:$0xff] }
 0x123   : > { %v556_v6 = vmax.f32 %v527_v2, 0.0  ;;  %1082 = vmatpush.msra.mxu0 %v1456_v26  ;;  %v1405_v2 = vld [vmem:[%s2646_s3 + $0x508] sm:$0xff]  ;;  %v1490_v22 = vld [vmem:[%s2646_s3 + $0x7b0] sm:$0xff]  ;;  %v1476_v26 = vld [vmem:[%s2646_s3 + $0x740] sm:$0xff] }
 0x124   : > { %820 = vmatpush.msrb.mxu2 %v1340_v1  ;;  %998 = vmatpush.msra.mxu3 %v1432_v3 }
 0x125   : > { %821 = vmatmul.f32.vlgmr.msrb.gmra.mxu2 %v553_v4  ;;  %935 = vmatmul.f32.vlgmr.msrb.gmra.mxu0 %v556_v6  ;;  %v532_v21 = vpop.f32.mrf.mxu1  ;;  %v1497_v4 = vld [vmem:[%s2646_s3 + $0x7e8] sm:$0xff] }
 0x126   : > { %957 = vmatpush.msra.mxu2 %v1419_v5  ;;  %999 = vmatpush.msra.mxu3 %v1431_v7  ;;  %v2406_v12 = vpop.f32.mrf.mxu0  ;;  %v1404_v5 = vld [vmem:[%s2646_s3 + $0x500] sm:$0xff] }
 0x127   : > { %1083 = vmatpush.msra.mxu0 %v1455_v31  ;;  %v465_v57 = vadd.f32 %v2032_v34, %v2406_v12  ;;  %v1494_v12 = vld [vmem:[%s2646_s3 + $0x7d0] sm:$0xff]  ;;  %v1487_v31 = vld [vmem:[%s2646_s3 + $0x798] sm:$0xff] }
 0x128   : > { %958 = vmatpush.msra.mxu2 %v1418_v10  ;;  %1000 = vmatpush.msra.mxu3 %v1430_v11  ;;  %v1495_v10 = vld [vmem:[%s2646_s3 + $0x7d8] sm:$0xff]  ;;  %v1482_v11 = vld [vmem:[%s2646_s3 + $0x770] sm:$0xff] }
 0x129   : > { %1084 = vmatpush.msra.mxu0 %v1454_v36  ;;  %v530_v1 = vadd.f32 %v2374_v63, %v465_v57  ;;  %v1496_v63 = vld [vmem:[%s2646_s3 + $0x7e0] sm:$0xff]  ;;  %v1473_v36 = vld [vmem:[%s2646_s3 + $0x728] sm:$0xff] }
 0x12a   : > { %959 = vmatpush.msra.mxu2 %v1417_v15  ;;  %1001 = vmatpush.msra.mxu3 %v1429_v16  ;;  %v1493_v15 = vld [vmem:[%s2646_s3 + $0x7c8] sm:$0xff] }
 0x12b   : > { %1085 = vmatpush.msra.mxu0 %v1453_v40  ;;  %v557_v7 = vmax.f32 %v530_v1, 0.0  ;;  %v1484_v40 = vld [vmem:[%s2646_s3 + $0x780] sm:$0xff] }
 0x12c   : > { %960 = vmatpush.msra.mxu2 %v1416_v19  ;;  %1002 = vmatpush.msra.mxu3 %v1428_v20  ;;  %v1479_v19 = vld [vmem:[%s2646_s3 + $0x758] sm:$0xff] }
 0x12d   : > { %v535_v44 = vpop.f32.mrf.mxu1  ;;  %1086 = vmatpush.msra.mxu0 %v1452_v45  ;;  %v1491_v20 = vld [vmem:[%s2646_s3 + $0x7b8] sm:$0xff] }
 0x12e   : > { %961 = vmatpush.msra.mxu2 %v1415_v24  ;;  %1003 = vmatpush.msra.mxu3 %v1427_v25  ;;  %v467_v30 = vpop.f32.mrf.mxu0  ;;  %v1477_v24 = vld [vmem:[%s2646_s3 + $0x748] sm:$0xff] }
 0x12f   : > { %v468_v38 = vadd.f32 %v2032_v34, %v467_v30  ;;  %v1489_v25 = vld [vmem:[%s2646_s3 + $0x7a8] sm:$0xff]  ;;  %v1475_v30 = vld [vmem:[%s2646_s3 + $0x738] sm:$0xff] }
 0x130   : > { %962 = vmatpush.msra.mxu2 %v1414_v28  ;;  %1004 = vmatpush.msra.mxu3 %v1426_v29 }
 0x131   : > { %v533_v47 = vadd.f32 %v532_v21, %v468_v38  ;;  %v1478_v21 = vld [vmem:[%s2646_s3 + $0x750] sm:$0xff]  ;;  %v1472_v38 = vld [vmem:[%s2646_s3 + $0x720] sm:$0xff] }
 0x132   : > { %963 = vmatpush.msra.mxu2 %v1413_v33  ;;  %1005 = vmatpush.msra.mxu3 %v1425_v35  ;;  %v1486_v35 = vld [vmem:[%s2646_s3 + $0x790] sm:$0xff] }
 0x133   : > { %v558_v53 = vmax.f32 %v533_v47, 0.0 }
 0x134   : > { %964 = vmatpush.msra.mxu2 %v1412_v37  ;;  %1006 = vmatpush.msra.mxu3 %v1424_v39  ;;  %v1485_v37 = vld [vmem:[%s2646_s3 + $0x788] sm:$0xff] }
 0x135   : > { %v538_v0 = vpop.f32.mrf.mxu1 }
 0x136   : > { %965 = vmatpush.msra.mxu2 %v1411_v42  ;;  %1007 = vmatpush.msra.mxu3 %v1423_v43  ;;  %v470_v49 = vpop.f32.mrf.mxu0  ;;  %v1471_v43 = vld [vmem:[%s2646_s3 + $0x718] sm:$0xff] }
 0x137   : > { %v471_v51 = vadd.f32 %v2032_v34, %v470_v49 }
 0x138   : > { %966 = vmatpush.msra.mxu2 %v1410_v46  ;;  %1008 = vmatpush.msra.mxu3 %v1422_v48  ;;  %v1469_v46 = vld [vmem:[%s2646_s3 + $0x708] sm:$0xff] }
 0x139   : > { %v536_v55 = vadd.f32 %v535_v44, %v471_v51  ;;  %v1470_v44 = vld [vmem:[%s2646_s3 + $0x710] sm:$0xff] }
 0x13a   : > { %967 = vmatpush.msra.mxu2 %v1409_v50  ;;  %1009 = vmatpush.msra.mxu3 %v1421_v52 }
 0x13b   : > { %v559_v59 = vmax.f32 %v536_v55, 0.0 }
 0x13c   : > { %968 = vmatpush.msra.mxu2 %v1408_v54  ;;  %1010 = vmatpush.msra.mxu3 %v1420_v56 }
 0x13d   : > { %1011 = vmatmul.f32.vlgmr.msra.gmra.mxu3 %v558_v53  ;;  %1049 = vmatmul.f32.vlgmr.msra.gmra.mxu1 %v559_v59  ;;  %v541_v16 = vpop.f32.mrf.mxu1 }
 0x13e   : > { %969 = vmatpush.msra.mxu2 %v1407_v58  ;;  %1147 = vmatpush.msrb.mxu3 %v1499_v60  ;;  %v473_v41 = vpop.f32.mrf.mxu0 }
 0x13f   : > { %v474_v3 = vadd.f32 %v2032_v34, %v473_v41 }
 0x140   : > { %970 = vmatpush.msra.mxu2 %v1406_v61  ;;  %1148 = vmatpush.msrb.mxu3 %v1498_v62 }
 0x141   : > { %v539_v6 = vadd.f32 %v538_v0, %v474_v3 }
 0x142   : > { %971 = vmatpush.msra.mxu2 %v1405_v2  ;;  %1149 = vmatpush.msrb.mxu3 %v1497_v4 }
 0x143   : > { %v560_v9 = vmax.f32 %v539_v6, 0.0 }
 0x144   : > { %972 = vmatpush.msra.mxu2 %v1404_v5  ;;  %1150 = vmatpush.msrb.mxu3 %v1496_v63 }
 0x145   : > { %973 = vmatmul.f32.vlgmr.msra.gmra.mxu2 %v557_v7  ;;  %1087 = vmatmul.f32.vlgmr.msra.gmra.mxu0 %v560_v9  ;;  %v544_v29 = vpop.f32.mrf.mxu1 }
 0x146   : > { %1109 = vmatpush.msrb.mxu2 %v1483_v8  ;;  %1151 = vmatpush.msrb.mxu3 %v1495_v10  ;;  %v476_v13 = vpop.f32.mrf.mxu0 }
 0x147   : > { %v477_v42 = vadd.f32 %v2032_v34, %v476_v13  ;;  %v1528_v13 = vld [vmem:[%s2647_s4] ss:$0 sm:$0xff] }
 0x148   : > { %1110 = vmatpush.msrb.mxu2 %v1482_v11  ;;  %1152 = vmatpush.msrb.mxu3 %v1494_v12 }
 0x149   : > { %v542_v45 = vadd.f32 %v541_v16, %v477_v42 }
 0x14a   : > { %1111 = vmatpush.msrb.mxu2 %v1481_v14  ;;  %1153 = vmatpush.msrb.mxu3 %v1493_v15 }
 0x14b   : > { %v561_v47 = vmax.f32 %v542_v45, 0.0 }
 0x14c   : > { %1112 = vmatpush.msrb.mxu2 %v1480_v17  ;;  %1154 = vmatpush.msrb.mxu3 %v1492_v18 }
 0x14e   : > { %1113 = vmatpush.msrb.mxu2 %v1479_v19  ;;  %1155 = vmatpush.msrb.mxu3 %v1491_v20  ;;  %v479_v23 = vpop.f32.mrf.mxu0 }
 0x14f   : > { %v480_v28 = vadd.f32 %v2032_v34, %v479_v23  ;;  %v1468_v34 = vld [vmem:[%s2646_s3 + $0x700] sm:$0xff] }
 0x150   : > { %1114 = vmatpush.msrb.mxu2 %v1478_v21  ;;  %1156 = vmatpush.msrb.mxu3 %v1490_v22 }
 0x151   : > { %v545_v33 = vadd.f32 %v544_v29, %v480_v28 }
 0x152   : > { %1115 = vmatpush.msrb.mxu2 %v1477_v24  ;;  %1157 = vmatpush.msrb.mxu3 %v1489_v25 }
 0x153   : > { %v562_v39 = vmax.f32 %v545_v33, 0.0 }
 0x154   : > { %1116 = vmatpush.msrb.mxu2 %v1476_v26  ;;  %1158 = vmatpush.msrb.mxu3 %v1488_v27 }
 0x156   : > { %1117 = vmatpush.msrb.mxu2 %v1475_v30  ;;  %1159 = vmatpush.msrb.mxu3 %v1487_v31 }
 0x158   : > { %1118 = vmatpush.msrb.mxu2 %v1474_v32  ;;  %1160 = vmatpush.msrb.mxu3 %v1486_v35 }
 0x15a   : > { %1119 = vmatpush.msrb.mxu2 %v1473_v36  ;;  %1161 = vmatpush.msrb.mxu3 %v1485_v37 }
 0x15c   : > { %1120 = vmatpush.msrb.mxu2 %v1472_v38  ;;  %1162 = vmatpush.msrb.mxu3 %v1484_v40 }
 0x15d   : > { %1163 = vmatmul.f32.vlgmr.msrb.gmra.mxu3 %v562_v39 }
 0x15e   : > { %1121 = vmatpush.msrb.mxu2 %v1471_v43 }
 0x160   : > { %1122 = vmatpush.msrb.mxu2 %v1470_v44  ;;  %v633_v49 = vpop.f32.mrf.mxu3 }
 0x162   : > { %1123 = vmatpush.msrb.mxu2 %v1469_v46 }
 0x164   : > { %1124 = vmatpush.msrb.mxu2 %v1468_v34 }
 0x165   : > { %1125 = vmatmul.f32.vlgmr.msrb.gmra.mxu2 %v561_v47 }
 0x168   : > { %v613_v48 = vpop.f32.mrf.mxu2 }
 0x169   : > { %v634_v52 = vadd.f32 %v633_v49, %v613_v48 }
 0x170   : > { %v670_v50 = vpop.f32.mrf.mxu2 }
 0x171   : > { %v673_v54 = vadd.f32 %v670_v50, %v634_v52 }
 0x178   : > { %v708_v51 = vpop.f32.mrf.mxu3 }
 0x179   : > { %v711_v55 = vadd.f32 %v708_v51, %v673_v54 }
 0x188   : > { %v746_v53 = vpop.f32.mrf.mxu2  ;;  %v784_v57 = vpop.f32.mrf.mxu3 }
 0x189   : > { %v749_v56 = vadd.f32 %v746_v53, %v711_v55 }
 0x18b   : > { %v787_v59 = vadd.f32 %v784_v57, %v749_v56 }
 0x19a   : > { %v898_v41 = vpop.f32.mrf.mxu1 }
 0x1a0   : > { %v860_v61 = vpop.f32.mrf.mxu3 }
 0x1a2   : > { %v936_v1 = vpop.f32.mrf.mxu0 }
 0x1a8   : > { %v822_v58 = vpop.f32.mrf.mxu2 }
 0x1a9   : > { %v825_v60 = vadd.f32 %v822_v58, %v787_v59 }
 0x1ab   : > { %v863_v62 = vadd.f32 %v860_v61, %v825_v60 }
 0x1ad   : > { %v901_v0 = vadd.f32 %v898_v41, %v863_v62 }
 0x1af   : > { %v939_v3 = vadd.f32 %v936_v1, %v901_v0 }
 0x1ba   : > { %v1050_v63 = vpop.f32.mrf.mxu1 }
 0x1c0   : > { %v1012_v5 = vpop.f32.mrf.mxu3 }
 0x1c2   : > { %v1088_v8 = vpop.f32.mrf.mxu0 }
 0x1c8   : > { %v974_v2 = vpop.f32.mrf.mxu2 }
 0x1c9   : > { %v977_v4 = vadd.f32 %v974_v2, %v939_v3 }
 0x1cb   : > { %v1015_v6 = vadd.f32 %v1012_v5, %v977_v4 }
 0x1cd   : > { %v1053_v7 = vadd.f32 %v1050_v63, %v1015_v6 }
 0x1cf   : > { %v1091_v9 = vadd.f32 %v1088_v8, %v1053_v7 }
 0x1e0   : > { %v1164_v11 = vpop.f32.mrf.mxu3 }
 0x1e8   : > { %v1126_v10 = vpop.f32.mrf.mxu2 }
 0x1e9   : > { %v1129_v12 = vadd.f32 %v1126_v10, %v1091_v9 }
 0x1eb   : > { %v1167_v14 = vadd.f32 %v1164_v11, %v1129_v12 }
 0x1ed   : > { %v1172_v15 = vadd.f32 %v1528_v13, %v1167_v14 }
 0x1ef   : > { %1174 = vst.msk [vmem:[%s304_s13] sm:$0xff] %vm1173_vm1, %v1172_v15 }
 0x1f0 PF: > { %p12_p9 = scmp.ge.s32.totalorder %s1600_s22, 4   ;;  %s2649_s18 = smov %s1547_s19 }
 0x1f1   : > { %s2650_s19 = smov %s1609_s25  ;;  %s2651_s20 = smov %s1600_s22 }
 0x1f2   :  { %14 = sbr.rel (!%p12_p9) target bundleno = 2 (0x2), region = 113 }

</bundles_post_ra>
